<compile_context>
chip_gen: v7x
topology: tpu7x:2x2x1
jax: 0.10.0
libtpu: 0.0.40
codegen_flags: <defaults>
</compile_context>

<pallas_src>
import functools

import jax
import jax.numpy as jnp
from jax.experimental import pallas as pl
from jax.experimental.pallas import tpu as pltpu


# ----------------------------- in-kernel helpers -------------------------------

def _layer_norm(y, g, b, eps):
    mean = jnp.mean(y, axis=-1, keepdims=True)
    cent = y - mean
    var = jnp.mean(cent * cent, axis=-1, keepdims=True)
    return cent * jax.lax.rsqrt(var + eps) * g + b


# ----------------- fused all-layers encoder-stack kernel ------------------------
# grid = (num_layers,). Per grid step: one full TransformerEncoderLayer.
# Hidden state h persists in VMEM scratch across layers; weights for layer l
# are selected by the grid index (auto-pipelined by BlockSpec).

def _encoder_stack_kernel(h0_ref, hb_ref,
                          wq_ref, wk_ref, wv_ref, bq_ref, bk_ref, bv_ref,
                          wo_ref, bo_ref, g1_ref, be1_ref,
                          w1_ref, b1_ref, w2_ref, b2_ref, g2_ref, be2_ref,
                          out_ref, h_scr, attn_scr, *, S, N, H, eps):
    l = pl.program_id(0)
    last = pl.num_programs(0) - 1

    @pl.when(l == 0)
    def _():
        h_scr[...] = h0_ref[...]

    M, E = h_scr.shape
    Dh = E // H
    scale = 1.0 / float(Dh) ** 0.5

    x = h_scr[...]                                   # (M, E) f32
    xb = x.astype(wq_ref.dtype)                      # one bf16 cast, reused

    # --- three separate projections (no lane-unaligned qkv column slices) ---
    q = (jnp.dot(xb, wq_ref[...], preferred_element_type=jnp.float32)
         + bq_ref[...]) * scale
    k = jnp.dot(xb, wk_ref[...], preferred_element_type=jnp.float32) + bk_ref[...]
    v = jnp.dot(xb, wv_ref[...], preferred_element_type=jnp.float32) + bv_ref[...]

    # Precomputed block-diagonal (E, E) 0/1 matrix: summing q*k over each
    # head's Dh lanes and broadcasting the score back across those lanes in
    # one MXU pass keeps everything lane-dense (rows, E)-shaped.
    head_blk = hb_ref[...]

    # Attention mixes over the S (= image batch) axis, independently per patch
    # position n. Rows are s-major, N is a multiple of 8 -> aligned slices.
    ks = [jax.lax.slice(k, (s * N, 0), ((s + 1) * N, E)) for s in range(S)]
    vs = [jax.lax.slice(v, (s * N, 0), ((s + 1) * N, E)) for s in range(S)]

    for s1 in range(S):                              # S is small: unrolled
        q1 = jax.lax.slice(q, (s1 * N, 0), ((s1 + 1) * N, E))
        scs = [jnp.dot(q1 * ks[s2], head_blk,
                       preferred_element_type=jnp.float32) for s2 in range(S)]
        m = scs[0]
        for t in scs[1:]:
            m = jnp.maximum(m, t)
        es = [jnp.exp(t - m) for t in scs]
        den = es[0]
        for t in es[1:]:
            den = den + t
        o = es[0] * vs[0]
        for s2 in range(1, S):
            o = o + es[s2] * vs[s2]
        # direct sublane-aligned row-slice write; no concatenate
        attn_scr[pl.ds(s1 * N, N), :] = o / den

    attn = attn_scr[...]                             # (M, E)
    proj = jnp.dot(attn.astype(wo_ref.dtype), wo_ref[...],
                   preferred_element_type=jnp.float32) + bo_ref[...]

    # post-LN (torch norm_first=False): h1 = LN1(x + attn)
    h1 = _layer_norm(x + proj, g1_ref[...], be1_ref[...], eps)

    # --- FFN in one shot (no reduction grid, full 2048-wide hidden in VMEM) ---
    hid = jnp.dot(h1.astype(w1_ref.dtype), w1_ref[...],
                  preferred_element_type=jnp.float32) + b1_ref[...]
    hid = jnp.maximum(hid, 0.0)
    ff = jnp.dot(hid.astype(w2_ref.dtype), w2_ref[...],
                 preferred_element_type=jnp.float32) + b2_ref[...]

    h2 = _layer_norm(h1 + ff, g2_ref[...], be2_ref[...], eps)
    h_scr[...] = h2

    @pl.when(l == last)
    def _():
        out_ref[...] = h2


def encoder_stack(h0, sp, head_blk, *, S, N, H, eps=1e-5):
    M, E = h0.shape
    L = sp["wq"].shape[0]
    F = sp["w1"].shape[-1]

    def const_spec(shape):
        nd = len(shape)
        return pl.BlockSpec(tuple(shape), lambda l, nd=nd: (0,) * nd)

    def per_layer(shape):
        nd = len(shape)
        return pl.BlockSpec((None,) + tuple(shape),
                            lambda l, nd=nd: (l,) + (0,) * nd)

    return pl.pallas_call(
        functools.partial(_encoder_stack_kernel, S=S, N=N, H=H, eps=eps),
        out_shape=jax.ShapeDtypeStruct((M, E), jnp.float32),
        grid=(L,),
        in_specs=[const_spec((M, E)), const_spec((E, E)),
                  per_layer((E, E)), per_layer((E, E)), per_layer((E, E)),
                  per_layer((1, E)), per_layer((1, E)), per_layer((1, E)),
                  per_layer((E, E)), per_layer((1, E)),
                  per_layer((1, E)), per_layer((1, E)),
                  per_layer((E, F)), per_layer((1, F)),
                  per_layer((F, E)), per_layer((1, E)),
                  per_layer((1, E)), per_layer((1, E))],
        out_specs=const_spec((M, E)),
        scratch_shapes=[pltpu.VMEM((M, E), jnp.float32),   # persistent h state
                        pltpu.VMEM((M, E), jnp.float32)],  # attention output
        compiler_params=pltpu.CompilerParams(
            dimension_semantics=("arbitrary",)),
    )(h0, head_blk,
      sp["wq"], sp["wk"], sp["wv"], sp["bq"], sp["bk"], sp["bv"],
      sp["wo"], sp["bo"], sp["ln1_w"], sp["ln1_b"],
      sp["w1"], sp["b1"], sp["w2"], sp["b2"], sp["ln2_w"], sp["ln2_b"])


# ------------------------------ model glue ---------------------------------

def custom_transformer_forward(x, params, *, num_patches, num_heads):
    B = x.shape[0]
    patches = x.reshape(B, num_patches, -1)              # == torch .view
    E = params["emb_w"].shape[1]

    # Tiny glue matmuls in plain XLA (per perf review): patch embedding ...
    emb = jnp.dot(patches, params["emb_w"]) + params["emb_b"]        # (B, P, E)
    cls = jnp.broadcast_to(params["cls_token"], (B, 1, E))
    h = jnp.concatenate([cls, emb], axis=1) + params["pos_emb"]      # (B, P+1, E)

    # Pad the patch axis once to a multiple of 8 (sublane alignment). Padded
    # positions never mix with valid ones (attention mixes only over the batch
    # axis per position) and only h[:, 0] is read at the end.
    N = num_patches + 1
    N_pad = ((N + 7) // 8) * 8
    if N_pad != N:
        h = jnp.pad(h, ((0, 0), (0, N_pad - N), (0, 0)))
    h0 = h.reshape(B * N_pad, E)                          # s-major rows

    # Block-diagonal head-sum matrix, hoisted out of the kernel (layer-invariant).
    Dh = E // num_heads
    r = jnp.arange(E)[:, None] // Dh
    c = jnp.arange(E)[None, :] // Dh
    head_blk = (r == c).astype(jnp.float32)

    h_out = encoder_stack(h0, params["stack"], head_blk,
                          S=B, N=N_pad, H=num_heads)      # ONE pallas_call

    cls_out = h_out.reshape(B, N_pad, E)[:, 0]            # (B, E)
    # ... and the final classifier.
    logits = jnp.dot(cls_out, params["fc_w"]) + params["fc_b"]
    return logits


def init_params(key, *, patch_size, num_patches, embed_dim, num_heads,
                num_layers, num_classes, dim_feedforward=2048):
    patch_dim = patch_size * patch_size * 3
    keys = jax.random.split(key, 4 + num_layers)

    def dense(k, fan_in, fan_out, w_dtype=jnp.float32):
        kw, kb = jax.random.split(k)
        w = (jax.random.normal(kw, (fan_in, fan_out), jnp.float32)
             / jnp.sqrt(jnp.float32(fan_in))).astype(w_dtype)
        b = jax.random.normal(kb, (1, fan_out), jnp.float32) * 0.01
        return w, b

    emb_w, emb_b = dense(keys[0], patch_dim, embed_dim)
    fc_w, fc_b = dense(keys[1], embed_dim, num_classes)
    pos_emb = jax.random.normal(keys[2], (1, num_patches + 1, embed_dim),
                                jnp.float32) * 0.02
    cls_token = jax.random.normal(keys[3], (1, 1, embed_dim), jnp.float32) * 0.02

    per_layer = []
    for i in range(num_layers):
        lk = jax.random.split(keys[4 + i], 6)
        # bf16 matmul weights (f32 accumulation in-kernel); f32 biases / LN.
        wq, bq = dense(lk[0], embed_dim, embed_dim, jnp.bfloat16)
        wk, bk = dense(lk[1], embed_dim, embed_dim, jnp.bfloat16)
        wv, bv = dense(lk[2], embed_dim, embed_dim, jnp.bfloat16)
        wo, bo = dense(lk[3], embed_dim, embed_dim, jnp.bfloat16)
        w1, b1 = dense(lk[4], embed_dim, dim_feedforward, jnp.bfloat16)
        w2, b2 = dense(lk[5], dim_feedforward, embed_dim, jnp.bfloat16)
        per_layer.append(dict(
            wq=wq, wk=wk, wv=wv, bq=bq, bk=bk, bv=bv, wo=wo, bo=bo,
            w1=w1, b1=b1, w2=w2, b2=b2,
            ln1_w=jnp.ones((1, embed_dim), jnp.float32),
            ln1_b=jnp.zeros((1, embed_dim), jnp.float32),
            ln2_w=jnp.ones((1, embed_dim), jnp.float32),
            ln2_b=jnp.zeros((1, embed_dim), jnp.float32)))

    # Stack per-layer params along a leading L axis (indexed by the grid).
    stack = {name: jnp.stack([lp[name] for lp in per_layer], axis=0)
             for name in per_layer[0]}

    return dict(emb_w=emb_w, emb_b=emb_b, fc_w=fc_w, fc_b=fc_b,
                pos_emb=pos_emb, cls_token=cls_token, stack=stack)


if __name__ == "__main__":
    # Small shapes consistent with the module: C*H*W == num_patches * patch_dim
    embed_dim, num_heads, num_layers, num_classes = 32, 4, 2, 3
    patch_size, num_patches = 4, 16          # patch_dim = 4*4*3 = 48
    B, C, H, W = 2, 3, 16, 16                # 3*16*16 = 16 * 48

    key = jax.random.PRNGKey(0)
    kx, kp = jax.random.split(key)
    x = jax.random.normal(kx, (B, C, H, W), jnp.float32)
    params = init_params(kp, patch_size=patch_size, num_patches=num_patches,
                         embed_dim=embed_dim, num_heads=num_heads,
                         num_layers=num_layers, num_classes=num_classes)

    fwd = jax.jit(functools.partial(custom_transformer_forward,
                                    num_patches=num_patches,
                                    num_heads=num_heads))
    logits = fwd(x, params)
    jax.block_until_ready(logits)
    assert logits.shape == (B, num_classes) and logits.dtype == jnp.float32
    assert bool(jnp.all(jnp.isfinite(logits)))
    print("KERNEL_OK")
</pallas_src>

<mosaic_0001>
module attributes {stable_mosaic.version = 11 : i64} {
  func.func @_encoder_stack_kernel(%arg0: i32, %arg1: memref<48x32xf32, #tpu.memory_space<vmem>>, %arg2: memref<32x32xf32, #tpu.memory_space<vmem>>, %arg3: memref<1x32x32xbf16, #tpu.memory_space<vmem>>, %arg4: memref<1x32x32xbf16, #tpu.memory_space<vmem>>, %arg5: memref<1x32x32xbf16, #tpu.memory_space<vmem>>, %arg6: memref<1x1x32xf32, #tpu.memory_space<vmem>>, %arg7: memref<1x1x32xf32, #tpu.memory_space<vmem>>, %arg8: memref<1x1x32xf32, #tpu.memory_space<vmem>>, %arg9: memref<1x32x32xbf16, #tpu.memory_space<vmem>>, %arg10: memref<1x1x32xf32, #tpu.memory_space<vmem>>, %arg11: memref<1x1x32xf32, #tpu.memory_space<vmem>>, %arg12: memref<1x1x32xf32, #tpu.memory_space<vmem>>, %arg13: memref<1x32x2048xbf16, #tpu.memory_space<vmem>>, %arg14: memref<1x1x2048xf32, #tpu.memory_space<vmem>>, %arg15: memref<1x2048x32xbf16, #tpu.memory_space<vmem>>, %arg16: memref<1x1x32xf32, #tpu.memory_space<vmem>>, %arg17: memref<1x1x32xf32, #tpu.memory_space<vmem>>, %arg18: memref<1x1x32xf32, #tpu.memory_space<vmem>>, %arg19: memref<48x32xf32, #tpu.memory_space<vmem>>, %arg20: memref<48x32xf32, #tpu.memory_space<vmem>>, %arg21: memref<48x32xf32, #tpu.memory_space<vmem>>) attributes {dimension_semantics = [#tpu.dimension_semantics<arbitrary>], iteration_bounds = array<i64: 2>, scalar_prefetch = 0 : i64, scratch_operands = 2 : i64, tpu.core_type = #tpu.core_type<tc>, window_params = [{pipeline_mode = #tpu.pipeline_mode<synchronous>, transform_indices = @transform_0, window_bounds = array<i64: 48, 32>}, {pipeline_mode = #tpu.pipeline_mode<synchronous>, transform_indices = @transform_1, window_bounds = array<i64: 32, 32>}, {transform_indices = @transform_2, window_bounds = array<i64: 1, 32, 32>}, {transform_indices = @transform_3, window_bounds = array<i64: 1, 32, 32>}, {transform_indices = @transform_4, window_bounds = array<i64: 1, 32, 32>}, {transform_indices = @transform_5, window_bounds = array<i64: 1, 1, 32>}, {transform_indices = @transform_6, window_bounds = array<i64: 1, 1, 32>}, {transform_indices = @transform_7, window_bounds = array<i64: 1, 1, 32>}, {transform_indices = @transform_8, window_bounds = array<i64: 1, 32, 32>}, {transform_indices = @transform_9, window_bounds = array<i64: 1, 1, 32>}, {transform_indices = @transform_10, window_bounds = array<i64: 1, 1, 32>}, {transform_indices = @transform_11, window_bounds = array<i64: 1, 1, 32>}, {transform_indices = @transform_12, window_bounds = array<i64: 1, 32, 2048>}, {transform_indices = @transform_13, window_bounds = array<i64: 1, 1, 2048>}, {transform_indices = @transform_14, window_bounds = array<i64: 1, 2048, 32>}, {transform_indices = @transform_15, window_bounds = array<i64: 1, 1, 32>}, {transform_indices = @transform_16, window_bounds = array<i64: 1, 1, 32>}, {transform_indices = @transform_17, window_bounds = array<i64: 1, 1, 32>}, {pipeline_mode = #tpu.pipeline_mode<synchronous>, transform_indices = @transform_18, window_bounds = array<i64: 48, 32>}]} {
    %c0_i32 = arith.constant 0 : i32
    %0 = arith.cmpi eq, %arg0, %c0_i32 : i32
    %1 = arith.extui %0 : i1 to i32
    %c0_i32_0 = arith.constant 0 : i32
    %2 = arith.cmpi ne, %1, %c0_i32_0 : i32
    scf.if %2 {
      %c0_81 = arith.constant 0 : index
      %c0_82 = arith.constant 0 : index
      %146 = vector.load %arg1[%c0_81, %c0_82] : memref<48x32xf32, #tpu.memory_space<vmem>>, vector<48x32xf32>
      %c0_83 = arith.constant 0 : index
      %c0_84 = arith.constant 0 : index
      %147 = vector.load %arg20[%c0_83, %c0_84] : memref<48x32xf32, #tpu.memory_space<vmem>>, vector<48x32xf32>
      tpu.vector_store %arg20[%c0_83, %c0_84], %146 {strides = array<i32>} : memref<48x32xf32, #tpu.memory_space<vmem>>, vector<48x32xf32>,
    } else {
    }
    %c0 = arith.constant 0 : index
    %c0_1 = arith.constant 0 : index
    %3 = vector.load %arg20[%c0, %c0_1] : memref<48x32xf32, #tpu.memory_space<vmem>>, vector<48x32xf32>
    %4 = arith.truncf %3 : vector<48x32xf32> to vector<48x32xbf16>
    %c0_2 = arith.constant 0 : index
    %c0_3 = arith.constant 0 : index
    %c0_4 = arith.constant 0 : index
    %5 = vector.load %arg3[%c0_2, %c0_3, %c0_4] : memref<1x32x32xbf16, #tpu.memory_space<vmem>>, vector<1x32x32xbf16>
    %6 = vector.shape_cast %5 : vector<1x32x32xbf16> to vector<32x32xbf16>
    %cst = arith.constant dense<0.000000e+00> : vector<48x32xf32>
    %7 = tpu.matmul %4, %6, %cst {dimension_numbers = #tpu.dot_dimension_numbers<[1], [0], [0], [1], [0, 0, 1, 1], [], []>} : vector<48x32xbf16>, vector<32x32xbf16>, vector<48x32xf32> -> vector<48x32xf32>
    %c0_5 = arith.constant 0 : index
    %c0_6 = arith.constant 0 : index
    %c0_7 = arith.constant 0 : index
    %8 = vector.load %arg6[%c0_5, %c0_6, %c0_7] : memref<1x1x32xf32, #tpu.memory_space<vmem>>, vector<1x1x32xf32>
    %9 = vector.shape_cast %8 : vector<1x1x32xf32> to vector<1x32xf32>
    %10 = vector.broadcast %9 : vector<1x32xf32> to vector<48x32xf32>
    %11 = arith.addf %7, %10 : vector<48x32xf32>
    %cst_8 = arith.constant 0.353553385 : f32
    %12 = vector.broadcast %cst_8 : f32 to vector<48x32xf32>
    %13 = arith.mulf %11, %12 : vector<48x32xf32>
    %c0_9 = arith.constant 0 : index
    %c0_10 = arith.constant 0 : index
    %c0_11 = arith.constant 0 : index
    %14 = vector.load %arg4[%c0_9, %c0_10, %c0_11] : memref<1x32x32xbf16, #tpu.memory_space<vmem>>, vector<1x32x32xbf16>
    %15 = vector.shape_cast %14 : vector<1x32x32xbf16> to vector<32x32xbf16>
    %cst_12 = arith.constant dense<0.000000e+00> : vector<48x32xf32>
    %16 = tpu.matmul %4, %15, %cst_12 {dimension_numbers = #tpu.dot_dimension_numbers<[1], [0], [0], [1], [0, 0, 1, 1], [], []>} : vector<48x32xbf16>, vector<32x32xbf16>, vector<48x32xf32> -> vector<48x32xf32>
    %c0_13 = arith.constant 0 : index
    %c0_14 = arith.constant 0 : index
    %c0_15 = arith.constant 0 : index
    %17 = vector.load %arg7[%c0_13, %c0_14, %c0_15] : memref<1x1x32xf32, #tpu.memory_space<vmem>>, vector<1x1x32xf32>
    %18 = vector.shape_cast %17 : vector<1x1x32xf32> to vector<1x32xf32>
    %19 = vector.broadcast %18 : vector<1x32xf32> to vector<48x32xf32>
    %20 = arith.addf %16, %19 : vector<48x32xf32>
    %c0_16 = arith.constant 0 : index
    %c0_17 = arith.constant 0 : index
    %c0_18 = arith.constant 0 : index
    %21 = vector.load %arg5[%c0_16, %c0_17, %c0_18] : memref<1x32x32xbf16, #tpu.memory_space<vmem>>, vector<1x32x32xbf16>
    %22 = vector.shape_cast %21 : vector<1x32x32xbf16> to vector<32x32xbf16>
    %cst_19 = arith.constant dense<0.000000e+00> : vector<48x32xf32>
    %23 = tpu.matmul %4, %22, %cst_19 {dimension_numbers = #tpu.dot_dimension_numbers<[1], [0], [0], [1], [0, 0, 1, 1], [], []>} : vector<48x32xbf16>, vector<32x32xbf16>, vector<48x32xf32> -> vector<48x32xf32>
    %c0_20 = arith.constant 0 : index
    %c0_21 = arith.constant 0 : index
    %c0_22 = arith.constant 0 : index
    %24 = vector.load %arg8[%c0_20, %c0_21, %c0_22] : memref<1x1x32xf32, #tpu.memory_space<vmem>>, vector<1x1x32xf32>
    %25 = vector.shape_cast %24 : vector<1x1x32xf32> to vector<1x32xf32>
    %26 = vector.broadcast %25 : vector<1x32xf32> to vector<48x32xf32>
    %27 = arith.addf %23, %26 : vector<48x32xf32>
    %c0_23 = arith.constant 0 : index
    %c0_24 = arith.constant 0 : index
    %28 = vector.load %arg2[%c0_23, %c0_24] : memref<32x32xf32, #tpu.memory_space<vmem>>, vector<32x32xf32>
    %29 = vector.extract_strided_slice %20 {offsets = [0, 0], sizes = [24, 32], strides = [1, 1]} : vector<48x32xf32> to vector<24x32xf32>
    %30 = vector.extract_strided_slice %20 {offsets = [24, 0], sizes = [24, 32], strides = [1, 1]} : vector<48x32xf32> to vector<24x32xf32>
    %31 = vector.extract_strided_slice %27 {offsets = [0, 0], sizes = [24, 32], strides = [1, 1]} : vector<48x32xf32> to vector<24x32xf32>
    %32 = vector.extract_strided_slice %27 {offsets = [24, 0], sizes = [24, 32], strides = [1, 1]} : vector<48x32xf32> to vector<24x32xf32>
    %33 = vector.extract_strided_slice %13 {offsets = [0, 0], sizes = [24, 32], strides = [1, 1]} : vector<48x32xf32> to vector<24x32xf32>
    %34 = arith.mulf %33, %29 : vector<24x32xf32>
    %cst_25 = arith.constant dense<0.000000e+00> : vector<24x32xf32>
    %35 = tpu.matmul %34, %28, %cst_25 {dimension_numbers = #tpu.dot_dimension_numbers<[1], [0], [0], [1], [0, 0, 1, 1], [], []>} : vector<24x32xf32>, vector<32x32xf32>, vector<24x32xf32> -> vector<24x32xf32>
    %36 = arith.mulf %33, %30 : vector<24x32xf32>
    %cst_26 = arith.constant dense<0.000000e+00> : vector<24x32xf32>
    %37 = tpu.matmul %36, %28, %cst_26 {dimension_numbers = #tpu.dot_dimension_numbers<[1], [0], [0], [1], [0, 0, 1, 1], [], []>} : vector<24x32xf32>, vector<32x32xf32>, vector<24x32xf32> -> vector<24x32xf32>
    %38 = arith.maximumf %35, %37 : vector<24x32xf32>
    %39 = arith.subf %35, %38 : vector<24x32xf32>
    %40 = math.exp %39 : vector<24x32xf32>
    %41 = arith.subf %37, %38 : vector<24x32xf32>
    %42 = math.exp %41 : vector<24x32xf32>
    %43 = arith.addf %40, %42 : vector<24x32xf32>
    %44 = arith.mulf %40, %31 : vector<24x32xf32>
    %45 = arith.mulf %42, %32 : vector<24x32xf32>
    %46 = arith.addf %44, %45 : vector<24x32xf32>
    %47 = arith.divf %46, %43 : vector<24x32xf32>
    %c0_27 = arith.constant 0 : index
    %c0_28 = arith.constant 0 : index
    %48 = vector.load %arg21[%c0_27, %c0_28] : memref<48x32xf32, #tpu.memory_space<vmem>>, vector<24x32xf32>
    tpu.vector_store %arg21[%c0_27, %c0_28], %47 {strides = array<i32>} : memref<48x32xf32, #tpu.memory_space<vmem>>, vector<24x32xf32>,
    %49 = vector.extract_strided_slice %13 {offsets = [24, 0], sizes = [24, 32], strides = [1, 1]} : vector<48x32xf32> to vector<24x32xf32>
    %50 = arith.mulf %49, %29 : vector<24x32xf32>
    %cst_29 = arith.constant dense<0.000000e+00> : vector<24x32xf32>
    %51 = tpu.matmul %50, %28, %cst_29 {dimension_numbers = #tpu.dot_dimension_numbers<[1], [0], [0], [1], [0, 0, 1, 1], [], []>} : vector<24x32xf32>, vector<32x32xf32>, vector<24x32xf32> -> vector<24x32xf32>
    %52 = arith.mulf %49, %30 : vector<24x32xf32>
    %cst_30 = arith.constant dense<0.000000e+00> : vector<24x32xf32>
    %53 = tpu.matmul %52, %28, %cst_30 {dimension_numbers = #tpu.dot_dimension_numbers<[1], [0], [0], [1], [0, 0, 1, 1], [], []>} : vector<24x32xf32>, vector<32x32xf32>, vector<24x32xf32> -> vector<24x32xf32>
    %54 = arith.maximumf %51, %53 : vector<24x32xf32>
    %55 = arith.subf %51, %54 : vector<24x32xf32>
    %56 = math.exp %55 : vector<24x32xf32>
    %57 = arith.subf %53, %54 : vector<24x32xf32>
    %58 = math.exp %57 : vector<24x32xf32>
    %59 = arith.addf %56, %58 : vector<24x32xf32>
    %60 = arith.mulf %56, %31 : vector<24x32xf32>
    %61 = arith.mulf %58, %32 : vector<24x32xf32>
    %62 = arith.addf %60, %61 : vector<24x32xf32>
    %63 = arith.divf %62, %59 : vector<24x32xf32>
    %c24 = arith.constant 24 : index
    %c0_31 = arith.constant 0 : index
    %64 = vector.load %arg21[%c24, %c0_31] : memref<48x32xf32, #tpu.memory_space<vmem>>, vector<24x32xf32>
    tpu.vector_store %arg21[%c24, %c0_31], %63 {strides = array<i32>} : memref<48x32xf32, #tpu.memory_space<vmem>>, vector<24x32xf32>,
    %c0_32 = arith.constant 0 : index
    %c0_33 = arith.constant 0 : index
    %65 = vector.load %arg21[%c0_32, %c0_33] : memref<48x32xf32, #tpu.memory_space<vmem>>, vector<48x32xf32>
    %66 = arith.truncf %65 : vector<48x32xf32> to vector<48x32xbf16>
    %c0_34 = arith.constant 0 : index
    %c0_35 = arith.constant 0 : index
    %c0_36 = arith.constant 0 : index
    %67 = vector.load %arg9[%c0_34, %c0_35, %c0_36] : memref<1x32x32xbf16, #tpu.memory_space<vmem>>, vector<1x32x32xbf16>
    %68 = vector.shape_cast %67 : vector<1x32x32xbf16> to vector<32x32xbf16>
    %cst_37 = arith.constant dense<0.000000e+00> : vector<48x32xf32>
    %69 = tpu.matmul %66, %68, %cst_37 {dimension_numbers = #tpu.dot_dimension_numbers<[1], [0], [0], [1], [0, 0, 1, 1], [], []>} : vector<48x32xbf16>, vector<32x32xbf16>, vector<48x32xf32> -> vector<48x32xf32>
    %c0_38 = arith.constant 0 : index
    %c0_39 = arith.constant 0 : index
    %c0_40 = arith.constant 0 : index
    %70 = vector.load %arg10[%c0_38, %c0_39, %c0_40] : memref<1x1x32xf32, #tpu.memory_space<vmem>>, vector<1x1x32xf32>
    %71 = vector.shape_cast %70 : vector<1x1x32xf32> to vector<1x32xf32>
    %72 = vector.broadcast %71 : vector<1x32xf32> to vector<48x32xf32>
    %73 = arith.addf %69, %72 : vector<48x32xf32>
    %74 = arith.addf %3, %73 : vector<48x32xf32>
    %c0_41 = arith.constant 0 : index
    %c0_42 = arith.constant 0 : index
    %c0_43 = arith.constant 0 : index
    %75 = vector.load %arg11[%c0_41, %c0_42, %c0_43] : memref<1x1x32xf32, #tpu.memory_space<vmem>>, vector<1x1x32xf32>
    %76 = vector.shape_cast %75 : vector<1x1x32xf32> to vector<1x32xf32>
    %c0_44 = arith.constant 0 : index
    %c0_45 = arith.constant 0 : index
    %c0_46 = arith.constant 0 : index
    %77 = vector.load %arg12[%c0_44, %c0_45, %c0_46] : memref<1x1x32xf32, #tpu.memory_space<vmem>>, vector<1x1x32xf32>
    %78 = vector.shape_cast %77 : vector<1x1x32xf32> to vector<1x32xf32>
    %cst_47 = arith.constant dense<0.000000e+00> : vector<48xf32>
    %79 = vector.multi_reduction <add>, %74, %cst_47 [1] : vector<48x32xf32> to vector<48xf32>
    %80 = vector.shape_cast %79 : vector<48xf32> to vector<48x1xf32>
    %cst_48 = arith.constant 3.200000e+01 : f32
    %81 = vector.broadcast %cst_48 : f32 to vector<48x1xf32>
    %82 = arith.divf %80, %81 : vector<48x1xf32>
    %83 = vector.broadcast %82 : vector<48x1xf32> to vector<48x32xf32>
    %84 = arith.subf %74, %83 : vector<48x32xf32>
    %85 = arith.mulf %84, %84 : vector<48x32xf32>
    %cst_49 = arith.constant dense<0.000000e+00> : vector<48xf32>
    %86 = vector.multi_reduction <add>, %85, %cst_49 [1] : vector<48x32xf32> to vector<48xf32>
    %87 = vector.shape_cast %86 : vector<48xf32> to vector<48x1xf32>
    %cst_50 = arith.constant 3.200000e+01 : f32
    %88 = vector.broadcast %cst_50 : f32 to vector<48x1xf32>
    %89 = arith.divf %87, %88 : vector<48x1xf32>
    %cst_51 = arith.constant 9.99999974E-6 : f32
    %90 = vector.broadcast %cst_51 : f32 to vector<48x1xf32>
    %91 = arith.addf %89, %90 : vector<48x1xf32>
    %92 = math.rsqrt %91 : vector<48x1xf32>
    %93 = vector.broadcast %92 : vector<48x1xf32> to vector<48x32xf32>
    %94 = arith.mulf %84, %93 : vector<48x32xf32>
    %95 = vector.broadcast %76 : vector<1x32xf32> to vector<48x32xf32>
    %96 = arith.mulf %94, %95 : vector<48x32xf32>
    %97 = vector.broadcast %78 : vector<1x32xf32> to vector<48x32xf32>
    %98 = arith.addf %96, %97 : vector<48x32xf32>
    %99 = arith.truncf %98 : vector<48x32xf32> to vector<48x32xbf16>
    %c0_52 = arith.constant 0 : index
    %c0_53 = arith.constant 0 : index
    %c0_54 = arith.constant 0 : index
    %100 = vector.load %arg13[%c0_52, %c0_53, %c0_54] : memref<1x32x2048xbf16, #tpu.memory_space<vmem>>, vector<1x32x2048xbf16>
    %101 = vector.shape_cast %100 : vector<1x32x2048xbf16> to vector<32x2048xbf16>
    %cst_55 = arith.constant dense<0.000000e+00> : vector<48x2048xf32>
    %102 = tpu.matmul %99, %101, %cst_55 {dimension_numbers = #tpu.dot_dimension_numbers<[1], [0], [0], [1], [0, 0, 1, 1], [], []>} : vector<48x32xbf16>, vector<32x2048xbf16>, vector<48x2048xf32> -> vector<48x2048xf32>
    %c0_56 = arith.constant 0 : index
    %c0_57 = arith.constant 0 : index
    %c0_58 = arith.constant 0 : index
    %103 = vector.load %arg14[%c0_56, %c0_57, %c0_58] : memref<1x1x2048xf32, #tpu.memory_space<vmem>>, vector<1x1x2048xf32>
    %104 = vector.shape_cast %103 : vector<1x1x2048xf32> to vector<1x2048xf32>
    %105 = vector.broadcast %104 : vector<1x2048xf32> to vector<48x2048xf32>
    %106 = arith.addf %102, %105 : vector<48x2048xf32>
    %cst_59 = arith.constant 0.000000e+00 : f32
    %107 = vector.broadcast %cst_59 : f32 to vector<48x2048xf32>
    %108 = arith.maximumf %106, %107 : vector<48x2048xf32>
    %109 = arith.truncf %108 : vector<48x2048xf32> to vector<48x2048xbf16>
    %c0_60 = arith.constant 0 : index
    %c0_61 = arith.constant 0 : index
    %c0_62 = arith.constant 0 : index
    %110 = vector.load %arg15[%c0_60, %c0_61, %c0_62] : memref<1x2048x32xbf16, #tpu.memory_space<vmem>>, vector<1x2048x32xbf16>
    %111 = vector.shape_cast %110 : vector<1x2048x32xbf16> to vector<2048x32xbf16>
    %cst_63 = arith.constant dense<0.000000e+00> : vector<48x32xf32>
    %112 = tpu.matmul %109, %111, %cst_63 {dimension_numbers = #tpu.dot_dimension_numbers<[1], [0], [0], [1], [0, 0, 1, 1], [], []>} : vector<48x2048xbf16>, vector<2048x32xbf16>, vector<48x32xf32> -> vector<48x32xf32>
    %c0_64 = arith.constant 0 : index
    %c0_65 = arith.constant 0 : index
    %c0_66 = arith.constant 0 : index
    %113 = vector.load %arg16[%c0_64, %c0_65, %c0_66] : memref<1x1x32xf32, #tpu.memory_space<vmem>>, vector<1x1x32xf32>
    %114 = vector.shape_cast %113 : vector<1x1x32xf32> to vector<1x32xf32>
    %115 = vector.broadcast %114 : vector<1x32xf32> to vector<48x32xf32>
    %116 = arith.addf %112, %115 : vector<48x32xf32>
    %117 = arith.addf %98, %116 : vector<48x32xf32>
    %c0_67 = arith.constant 0 : index
    %c0_68 = arith.constant 0 : index
    %c0_69 = arith.constant 0 : index
    %118 = vector.load %arg17[%c0_67, %c0_68, %c0_69] : memref<1x1x32xf32, #tpu.memory_space<vmem>>, vector<1x1x32xf32>
    %119 = vector.shape_cast %118 : vector<1x1x32xf32> to vector<1x32xf32>
    %c0_70 = arith.constant 0 : index
    %c0_71 = arith.constant 0 : index
    %c0_72 = arith.constant 0 : index
    %120 = vector.load %arg18[%c0_70, %c0_71, %c0_72] : memref<1x1x32xf32, #tpu.memory_space<vmem>>, vector<1x1x32xf32>
    %121 = vector.shape_cast %120 : vector<1x1x32xf32> to vector<1x32xf32>
    %cst_73 = arith.constant dense<0.000000e+00> : vector<48xf32>
    %122 = vector.multi_reduction <add>, %117, %cst_73 [1] : vector<48x32xf32> to vector<48xf32>
    %123 = vector.shape_cast %122 : vector<48xf32> to vector<48x1xf32>
    %cst_74 = arith.constant 3.200000e+01 : f32
    %124 = vector.broadcast %cst_74 : f32 to vector<48x1xf32>
    %125 = arith.divf %123, %124 : vector<48x1xf32>
    %126 = vector.broadcast %125 : vector<48x1xf32> to vector<48x32xf32>
    %127 = arith.subf %117, %126 : vector<48x32xf32>
    %128 = arith.mulf %127, %127 : vector<48x32xf32>
    %cst_75 = arith.constant dense<0.000000e+00> : vector<48xf32>
    %129 = vector.multi_reduction <add>, %128, %cst_75 [1] : vector<48x32xf32> to vector<48xf32>
    %130 = vector.shape_cast %129 : vector<48xf32> to vector<48x1xf32>
    %cst_76 = arith.constant 3.200000e+01 : f32
    %131 = vector.broadcast %cst_76 : f32 to vector<48x1xf32>
    %132 = arith.divf %130, %131 : vector<48x1xf32>
    %cst_77 = arith.constant 9.99999974E-6 : f32
    %133 = vector.broadcast %cst_77 : f32 to vector<48x1xf32>
    %134 = arith.addf %132, %133 : vector<48x1xf32>
    %135 = math.rsqrt %134 : vector<48x1xf32>
    %136 = vector.broadcast %135 : vector<48x1xf32> to vector<48x32xf32>
    %137 = arith.mulf %127, %136 : vector<48x32xf32>
    %138 = vector.broadcast %119 : vector<1x32xf32> to vector<48x32xf32>
    %139 = arith.mulf %137, %138 : vector<48x32xf32>
    %140 = vector.broadcast %121 : vector<1x32xf32> to vector<48x32xf32>
    %141 = arith.addf %139, %140 : vector<48x32xf32>
    %c0_78 = arith.constant 0 : index
    %c0_79 = arith.constant 0 : index
    %142 = vector.load %arg20[%c0_78, %c0_79] : memref<48x32xf32, #tpu.memory_space<vmem>>, vector<48x32xf32>
    tpu.vector_store %arg20[%c0_78, %c0_79], %141 {strides = array<i32>} : memref<48x32xf32, #tpu.memory_space<vmem>>, vector<48x32xf32>,
    %c1_i32 = arith.constant 1 : i32
    %143 = arith.cmpi eq, %arg0, %c1_i32 : i32
    %144 = arith.extui %143 : i1 to i32
    %c0_i32_80 = arith.constant 0 : i32
    %145 = arith.cmpi ne, %144, %c0_i32_80 : i32
    scf.if %145 {
      %c0_81 = arith.constant 0 : index
      %c0_82 = arith.constant 0 : index
      %146 = vector.load %arg19[%c0_81, %c0_82] : memref<48x32xf32, #tpu.memory_space<vmem>>, vector<48x32xf32>
      tpu.vector_store %arg19[%c0_81, %c0_82], %141 {strides = array<i32>} : memref<48x32xf32, #tpu.memory_space<vmem>>, vector<48x32xf32>,
    } else {
    }
    return
  }
  func.func @transform_0(%arg0: i32) -> (i32, i32) {
    %c0_i32 = arith.constant 0 : i32
    %c0_i32_0 = arith.constant 0 : i32
    %c0_i32_1 = arith.constant 0 : i32
    return %c0_i32, %c0_i32_0 : i32, i32
  }
  func.func @transform_1(%arg0: i32) -> (i32, i32) {
    %c0_i32 = arith.constant 0 : i32
    %c0_i32_0 = arith.constant 0 : i32
    %c0_i32_1 = arith.constant 0 : i32
    return %c0_i32, %c0_i32_0 : i32, i32
  }
  func.func @transform_2(%arg0: i32) -> (i32, i32, i32) {
    %c0_i32 = arith.constant 0 : i32
    %c0_i32_0 = arith.constant 0 : i32
    %c0_i32_1 = arith.constant 0 : i32
    return %arg0, %c0_i32, %c0_i32_0 : i32, i32, i32
  }
  func.func @transform_3(%arg0: i32) -> (i32, i32, i32) {
    %c0_i32 = arith.constant 0 : i32
    %c0_i32_0 = arith.constant 0 : i32
    %c0_i32_1 = arith.constant 0 : i32
    return %arg0, %c0_i32, %c0_i32_0 : i32, i32, i32
  }
  func.func @transform_4(%arg0: i32) -> (i32, i32, i32) {
    %c0_i32 = arith.constant 0 : i32
    %c0_i32_0 = arith.constant 0 : i32
    %c0_i32_1 = arith.constant 0 : i32
    return %arg0, %c0_i32, %c0_i32_0 : i32, i32, i32
  }
  func.func @transform_5(%arg0: i32) -> (i32, i32, i32) {
    %c0_i32 = arith.constant 0 : i32
    %c0_i32_0 = arith.constant 0 : i32
    %c0_i32_1 = arith.constant 0 : i32
    return %arg0, %c0_i32, %c0_i32_0 : i32, i32, i32
  }
  func.func @transform_6(%arg0: i32) -> (i32, i32, i32) {
    %c0_i32 = arith.constant 0 : i32
    %c0_i32_0 = arith.constant 0 : i32
    %c0_i32_1 = arith.constant 0 : i32
    return %arg0, %c0_i32, %c0_i32_0 : i32, i32, i32
  }
  func.func @transform_7(%arg0: i32) -> (i32, i32, i32) {
    %c0_i32 = arith.constant 0 : i32
    %c0_i32_0 = arith.constant 0 : i32
    %c0_i32_1 = arith.constant 0 : i32
    return %arg0, %c0_i32, %c0_i32_0 : i32, i32, i32
  }
  func.func @transform_8(%arg0: i32) -> (i32, i32, i32) {
    %c0_i32 = arith.constant 0 : i32
    %c0_i32_0 = arith.constant 0 : i32
    %c0_i32_1 = arith.constant 0 : i32
    return %arg0, %c0_i32, %c0_i32_0 : i32, i32, i32
  }
  func.func @transform_9(%arg0: i32) -> (i32, i32, i32) {
    %c0_i32 = arith.constant 0 : i32
    %c0_i32_0 = arith.constant 0 : i32
    %c0_i32_1 = arith.constant 0 : i32
    return %arg0, %c0_i32, %c0_i32_0 : i32, i32, i32
  }
  func.func @transform_10(%arg0: i32) -> (i32, i32, i32) {
    %c0_i32 = arith.constant 0 : i32
    %c0_i32_0 = arith.constant 0 : i32
    %c0_i32_1 = arith.constant 0 : i32
    return %arg0, %c0_i32, %c0_i32_0 : i32, i32, i32
  }
  func.func @transform_11(%arg0: i32) -> (i32, i32, i32) {
    %c0_i32 = arith.constant 0 : i32
    %c0_i32_0 = arith.constant 0 : i32
    %c0_i32_1 = arith.constant 0 : i32
    return %arg0, %c0_i32, %c0_i32_0 : i32, i32, i32
  }
  func.func @transform_12(%arg0: i32) -> (i32, i32, i32) {
    %c0_i32 = arith.constant 0 : i32
    %c0_i32_0 = arith.constant 0 : i32
    %c0_i32_1 = arith.constant 0 : i32
    return %arg0, %c0_i32, %c0_i32_0 : i32, i32, i32
  }
  func.func @transform_13(%arg0: i32) -> (i32, i32, i32) {
    %c0_i32 = arith.constant 0 : i32
    %c0_i32_0 = arith.constant 0 : i32
    %c0_i32_1 = arith.constant 0 : i32
    return %arg0, %c0_i32, %c0_i32_0 : i32, i32, i32
  }
  func.func @transform_14(%arg0: i32) -> (i32, i32, i32) {
    %c0_i32 = arith.constant 0 : i32
    %c0_i32_0 = arith.constant 0 : i32
    %c0_i32_1 = arith.constant 0 : i32
    return %arg0, %c0_i32, %c0_i32_0 : i32, i32, i32
  }
  func.func @transform_15(%arg0: i32) -> (i32, i32, i32) {
    %c0_i32 = arith.constant 0 : i32
    %c0_i32_0 = arith.constant 0 : i32
    %c0_i32_1 = arith.constant 0 : i32
    return %arg0, %c0_i32, %c0_i32_0 : i32, i32, i32
  }
  func.func @transform_16(%arg0: i32) -> (i32, i32, i32) {
    %c0_i32 = arith.constant 0 : i32
    %c0_i32_0 = arith.constant 0 : i32
    %c0_i32_1 = arith.constant 0 : i32
    return %arg0, %c0_i32, %c0_i32_0 : i32, i32, i32
  }
  func.func @transform_17(%arg0: i32) -> (i32, i32, i32) {
    %c0_i32 = arith.constant 0 : i32
    %c0_i32_0 = arith.constant 0 : i32
    %c0_i32_1 = arith.constant 0 : i32
    return %arg0, %c0_i32, %c0_i32_0 : i32, i32, i32
  }
  func.func @transform_18(%arg0: i32) -> (i32, i32) {
    %c0_i32 = arith.constant 0 : i32
    %c0_i32_0 = arith.constant 0 : i32
    %c0_i32_1 = arith.constant 0 : i32
    return %c0_i32, %c0_i32_0 : i32, i32
  }
}

</mosaic_0001>

<bundles_post_ra>
// kernel: custom_transformer_forward.1
= control target key start
LH: loop header
LB: loop body
LE: loop exit
PB: predicated region body
PF: predicated region fallthrough
CT: control target
= control target key end

     0   :  { %s5531_s27 = smov 0   ;;  %s6437_s0 = inlined_call_operand.vmem [shape: f32[48,32], index: 0, kind: input, shape index: {}]   ;;  %s6438_s1 = inlined_call_operand.vmem [shape: f32[32,32], index: 1, kind: input, shape index: {}]   ;;  %s6439_s2 = inlined_call_operand.vmem [shape: bf16[2,32,32], index: 2, kind: input, shape index: {}]   ;;  %s6440_s3 = inlined_call_operand.vmem [shape: bf16[2,32,32], index: 3, kind: input, shape index: {}]   ;;  %s6441_s4 = inlined_call_operand.vmem [shape: bf16[2,32,32], index: 4, kind: input, shape index: {}]   ;;  %s6442_s5 = inlined_call_operand.vmem [shape: f32[2,1,32], index: 5, kind: input, shape index: {}]   ;;  %s6443_s6 = inlined_call_operand.vmem [shape: f32[2,1,32], index: 6, kind: input, shape index: {}]   ;;  %s6444_s7 = inlined_call_operand.vmem [shape: f32[2,1,32], index: 7, kind: input, shape index: {}]   ;;  %s6445_s8 = inlined_call_operand.vmem [shape: bf16[2,32,32], index: 8, kind: input, shape index: {}]   ;;  %s6446_s9 = inlined_call_operand.vmem [shape: f32[2,1,32], index: 9, kind: input, shape index: {}]   ;;  %s6447_s10 = inlined_call_operand.vmem [shape: f32[2,1,32], index: 10, kind: input, shape index: {}]   ;;  %s6448_s11 = inlined_call_operand.vmem [shape: f32[2,1,32], index: 11, kind: input, shape index: {}]   ;;  %s6449_s12 = inlined_call_operand.vmem [shape: bf16[2,32,2048], index: 12, kind: input, shape index: {}]   ;;  %s6450_s13 = inlined_call_operand.vmem [shape: f32[2,1,2048], index: 13, kind: input, shape index: {}]   ;;  %s6451_s14 = inlined_call_operand.vmem [shape: bf16[2,2048,32], index: 14, kind: input, shape index: {}]   ;;  %s6452_s15 = inlined_call_operand.vmem [shape: f32[2,1,32], index: 15, kind: input, shape index: {}]   ;;  %s6453_s16 = inlined_call_operand.vmem [shape: f32[2,1,32], index: 16, kind: input, shape index: {}]   ;;  %s6454_s17 = inlined_call_operand.vmem [shape: f32[2,1,32], index: 17, kind: input, shape index: {}]   ;;  %s6455_s18 = inlined_call_operand.vmem [shape: f32[48,32], index: 18, kind: output, shape index: {}]  }
   0x1   :  { %6463 = sst [smem:[#allocation8_spill]] %s6437_s0 }
   0x2   :  { %6464 = sst [smem:[#allocation9_spill]] %s6438_s1 }
   0x3   :  { %6465 = sst [smem:[#allocation10_spill]] %s6439_s2 }
   0x4   :  { %6466 = sst [smem:[#allocation11_spill]] %s6440_s3 }
   0x5   :  { %6467 = sst [smem:[#allocation12_spill]] %s6441_s4 }
   0x6   :  { %6468 = sst [smem:[#allocation13_spill]] %s6442_s5 }
   0x7   :  { %6469 = sst [smem:[#allocation14_spill]] %s6445_s8 }
   0x8   :  { %6470 = sst [smem:[#allocation15_spill]] %s6449_s12 }
   0x9   :  { %6471 = sst [smem:[#allocation16_spill]] %s6455_s18 }
   0xa LB: > { %6472 = sst [smem:[#allocation4_spill]] %s5430_s27  ;;  %s5537_s28 = sadd.s32 4294967295, %s5430_s27   ;;  %s5430_s27 = sphi %s5531_s27, %s28_s27  }
   0xb   : > { %6473 = sst [smem:[#allocation5_spill]] %s5537_s28  ;;  %p4485_p0 = scmp.ge.s32.totalorder %s5430_s27, 1 }
   0xc   : > { %p638_p1 = scmp.lt.s32.totalorder %s5430_s27, 3 }
   0xe   : > { %p639_p2 = pnand %p4485_p0, %p638_p1 }
  0x10   : > { %642 = sbr.rel (%p639_p2) target bundleno = 1964 (0x7ac), region = 92 }
  0x17   : > { %p743_p3 = scmp.lt.s32.totalorder %s5537_s28, 1  ;;  %s6475_s22 = sld [smem:[#allocation10_spill]] }
  0x18   : > { %s6476_s3 = sld [smem:[#allocation11_spill]]  ;;  %s6478_s4 = sld [smem:[#allocation12_spill]] }
  0x19   : > { %s5543_s29 = scalar_select %p743_p3, %s5537_s28, 1 }
  0x1a   : > { %s6480_s8 = sld [smem:[#allocation14_spill]]  ;;  %s6481_s12 = sld [smem:[#allocation15_spill]] }
  0x1b   : > { %s4728_s30 = sshll.u32 %s5543_s29, 4  ;;  %s4732_s19 = sshll.u32 %s5543_s29, 8 }
  0x1c   : > { %s797_s27 = scalar_lea.vmem %s6452_s15, %s5543_s29  ;;  %s803_s5 = scalar_lea.vmem %s6454_s17, %s5543_s29 }
  0x1d   : > { %s5553_s2 = scalar_lea.vmem %s6475_s22, %s4728_s30 }
  0x1e   : > { %s5558_s25 = scalar_lea.vmem %s6476_s3, %s4728_s30  ;;  %s5563_s18 = scalar_lea.vmem %s6478_s4, %s4728_s30 }
  0x1f   : > { %6477 = sst [smem:[#allocation6_spill]] %s5558_s25  ;;  %s4733_s3 = sshll.u32 %s5543_s29, 10 }
  0x20   : > { %6479 = sst [smem:[#allocation7_spill]] %s5563_s18  ;;  %s5576_s23 = scalar_lea.vmem %s6480_s8, %s4728_s30 }
  0x21   : > { %s5594_s21 = scalar_lea.vmem %s6481_s12, %s4732_s19  ;;  %s5599_s8 = scalar_lea.vmem %s6450_s13, %s4728_s30 }
  0x22   : > { %s5609_s18 = scalar_lea.vmem %s6451_s14, %s4733_s3  ;;  %s800_s19 = scalar_lea.vmem %s6453_s16, %s5543_s29 }
  0x23   : > { %s6482_s30 = sld [smem:[#allocation5_spill]] }
  0x29   : > { %p4499_p4 = scmp.ne.s32.totalorder %s6482_s30, 0 }
  0x2a   : > { %s6483_s25 = sld [smem:[#allocation8_spill]] (!%p4499_p4)  ;;  %vm815_vm0 = vcmask (!%p4499_p4), 261120  }
  0x2b   : > { %808 = sbr.rel (%p4499_p4) target bundleno = 52 (0x34), region = 96 }
  0x30   : > { %v809_v0 = vld [vmem:[%s6483_s25] sm:$0xff] (!%p4499_p4)  ;;  %v810_v1 = vld [vmem:[%s6483_s25 + $0x8] sm:$0xff] (!%p4499_p4)  ;;  %v811_v2 = vld [vmem:[%s6483_s25 + $0x10] sm:$0xff] (!%p4499_p4) }
  0x31   : > { %816 = vst.msk [vmem:[#allocation2] sm:$0xff] (!%p4499_p4), %vm815_vm0, %v809_v0  ;;  %817 = vst.msk [vmem:[#allocation2 + $0x8] sm:$0xff] (!%p4499_p4), %vm815_vm0, %v810_v1  ;;  %v812_v3 = vld [vmem:[%s6483_s25 + $0x18] sm:$0xff] (!%p4499_p4)  ;;  %v813_v4 = vld [vmem:[%s6483_s25 + $0x20] sm:$0xff] (!%p4499_p4) }
  0x32   : > { %818 = vst.msk [vmem:[#allocation2 + $0x10] sm:$0xff] %vm815_vm0, %v811_v2  ;;  %v814_v5 = vld [vmem:[%s6483_s25 + $0x28] sm:$0xff]  ;;  %819 = vst.msk [vmem:[#allocation2 + $0x18] sm:$0xff] %vm815_vm0, %v812_v3 }
  0x33   : > { %820 = vst.msk [vmem:[#allocation2 + $0x20] sm:$0xff] %vm815_vm0, %v813_v4  ;;  %821 = vst.msk [vmem:[#allocation2 + $0x28] sm:$0xff] %vm815_vm0, %v814_v5 }
  0x34 PF: > { %s6484_s22 = sld [smem:[#allocation6_spill]]  ;;  %v5222_v6 = vld [vmem:[%s5553_s2] sm:$0xff]   ;;  %v5432_v7 = vmov 0.0   ;;  %v5224_v9 = vld [vmem:[%s5553_s2 + $0x8] sm:$0xff]   ;;  %vm5433_vm1 = vmmov 0   ;;  %vm854_vm2 = vcmask 261120   ;;  %s6489_s0 = scalar_lea.vmem %s6443_s6, %s5543_s29 }
  0x35   : > { %5054 = vmatprep.subr.bf16.mxu0 %v5432_v7  ;;  %5070 = vmatprep.subr.bf16.mxu1 %v5432_v7  ;;  %s6485_s4 = sld [smem:[#allocation9_spill]]  ;;  %v5434_v21 = vmov 0.0|0.0   ;;  %s6486_s12 = sld [smem:[#allocation7_spill]]  ;;  %v4506_v30 = vld [vmem:[%s6489_s0] ss:$0 sm:$0xff] }
  0x36   : > { %5055 = vmatpush3.bf16.msra.mxu0 %v5222_v6  ;;  %5058 = vmatprep.mubr.msk.bf16.mxu0 %vm5433_vm1, %v5432_v7  ;;  %s6487_s24 = sld [smem:[#allocation13_spill]]  ;;  %s6490_s1 = scalar_lea.vmem %s6444_s7, %s5543_s29 }
  0x37   : > { %5056 = vmatprep.subr.bf16.mxu0 %v5432_v7  ;;  %5074 = vmatprep.mubr.msk.bf16.mxu1 %vm5433_vm1, %v5432_v7  ;;  %s6491_s30 = scalar_lea.vmem %s6446_s9, %s5543_s29  ;;  %s6493_s0 = scalar_lea.vmem %s6448_s11, %s5543_s29 }
  0x3a   : > { %v5223_v8 = vld [vmem:[%s6484_s22] sm:$0xff]   ;;  %v5225_v10 = vld [vmem:[%s6484_s22 + $0x8] sm:$0xff]   ;;  %5057 = vmatpush3.bf16.msra.mxu0 %v5224_v9 }
  0x3b   : > { %5071 = vmatpush3.bf16.msra.mxu1 %v5223_v8  ;;  %v822_v11 = vld [vmem:[#allocation2] sm:$0xff]  ;;  %v823_v12 = vld [vmem:[#allocation2 + $0x8] sm:$0xff]  ;;  %v1089_v17 = vld [vmem:[%s6485_s4 + $0x10] sm:$0xff]  ;;  %5086 = vmatprep.subr.bf16.mxu0 %v5432_v7 }
  0x3c   : > { %5072 = vmatprep.subr.bf16.mxu1 %v5432_v7  ;;  %v828_v13 = vpack.c.bf16 %v823_v12, %v822_v11  ;;  %v1087_v14 = vld [vmem:[%s6485_s4] sm:$0xff]  ;;  %v1088_v15 = vld [vmem:[%s6485_s4 + $0x8] sm:$0xff]  ;;  %v1090_v18 = vld [vmem:[%s6485_s4 + $0x18] sm:$0xff]  ;;  %s6488_s2 = scalar_lea.vmem %s6487_s24, %s5543_s29 }
  0x3d   : > { %v5656_v16 = vpack.c.bf16 %v1088_v15, %v1087_v14  ;;  %v824_v19 = vld [vmem:[#allocation2 + $0x10] sm:$0xff]  ;;  %v825_v20 = vld [vmem:[#allocation2 + $0x18] sm:$0xff]  ;;  %v5673_v22 = vpack.c.bf16 %v1090_v18, %v1089_v17  ;;  %v826_v24 = vld [vmem:[#allocation2 + $0x20] sm:$0xff] }
  0x3e   : > { %5059 = vmatmul.mubr.msk.bf16.vlgmr.msra.gmra.mrb[0].mxu0 %vm854_vm2, %v828_v13  ;;  %v829_v23 = vpack.c.bf16 %v825_v20, %v824_v19  ;;  %v827_v25 = vld [vmem:[#allocation2 + $0x28] sm:$0xff]  ;;  %v5226_v27 = vld [vmem:[%s6486_s12] sm:$0xff]  }
  0x3f   : > { %5073 = vmatpush3.bf16.msra.mxu1 %v5225_v10  ;;  %5062 = vmatprep.mubr.msk.bf16.mxu0 %vm5433_vm1, %v5432_v7  ;;  %v830_v26 = vpack.c.bf16 %v827_v25, %v826_v24  ;;  %v5227_v28 = vld [vmem:[%s6486_s12 + $0x8] sm:$0xff]   ;;  %v4500_v29 = vld [vmem:[%s6488_s2] ss:$0 sm:$0xff]  ;;  %s6492_s2 = scalar_lea.vmem %s6447_s10, %s5543_s29  ;;  %s6494_s29 = sld [smem:[#allocation5_spill]] }
  0x40   : > { %5186 = vmatprep.subr.bf16.mxu1 %v5434_v21  ;;  %5087 = vmatpush3.bf16.msra.mxu0 %v5226_v27 }
  0x41   : > { %5088 = vmatprep.subr.bf16.mxu0 %v5432_v7 }
  0x42   : > { %5075 = vmatmul.mubr.msk.bf16.vlgmr.msra.gmra.mrb[0].mxu1 %vm854_vm2, %v828_v13 }
  0x43   : > { %5078 = vmatprep.mubr.msk.bf16.mxu1 %vm5433_vm1, %v5432_v7  ;;  %5188 = vmatpush3.bf16.msra.mxu1 %v5656_v16 }
  0x44   : > { %5189 = vmatprep.subr.bf16.mxu1 %v5434_v21  ;;  %5089 = vmatpush3.bf16.msra.mxu0 %v5227_v28 }
  0x45   : > { %5170 = vmatprep.subr.bf16.mxu0 %v5432_v7  ;;  %p4725_p5 = scmp.ne.s32.totalorder %s6494_s29, 1 }
  0x46   : > { %5063 = vmatmul.mubr.msk.bf16.gmra.mrb[4].mxu0 %vm854_vm2, %v829_v23 }
  0x47   : > { %5191 = vmatpush3.bf16.msra.mxu1 %v5673_v22  ;;  %5066 = vmatprep.mubr.msk.bf16.mxu0 %vm5433_vm1, %v5432_v7 }
  0x48   : > { %5192 = vmatprep.subr.bf16.mxu1 %v5434_v21 }
  0x4a   : > { %5079 = vmatmul.mubr.msk.bf16.gmra.mrb[4].mxu1 %vm854_vm2, %v829_v23 }
  0x4b   : > { %5082 = vmatprep.mubr.msk.bf16.mxu1 %vm5433_vm1, %v5432_v7 }
  0x4e   : > { %5067 = vmatmul.mubr.msk.bf16.gmra.mrb[8].mxu0 %vm854_vm2, %v830_v26 }
  0x4f   : > { %5090 = vmatprep.mubr.msk.bf16.mxu0 %vm5433_vm1, %v5432_v7 }
  0x52   : > { %5083 = vmatmul.mubr.msk.bf16.gmra.mrb[8].mxu1 %vm854_vm2, %v830_v26 }
  0x53   : > { %5110 = vmatprep.mubr.msk.f32.mxu1 %vm5433_vm1, %v5432_v7 }
  0x56   : > { %5091 = vmatmul.mubr.msk.bf16.vlgmr.msra.gmra.mrb[12].mxu0 %vm854_vm2, %v828_v13 }
  0x57   : > { %5094 = vmatprep.mubr.msk.bf16.mxu0 %vm5433_vm1, %v5432_v7 }
  0x5e   : > { %5095 = vmatmul.mubr.msk.bf16.gmra.mrb[16].mxu0 %vm854_vm2, %v829_v23 }
  0x5f   : > { %5098 = vmatprep.mubr.msk.bf16.mxu0 %vm5433_vm1, %v5432_v7 }
  0x66   : > { %5099 = vmatmul.mubr.msk.bf16.gmra.mrb[20].mxu0 %vm854_vm2, %v830_v26 }
  0x67   : > { %5174 = vmatprep.mubr.msk.bf16.mxu0 %vm5433_vm1, %v5432_v7 }
 0x111   : > { %v898_v31 = vpop.f32.mrb[0].mxu0 }
 0x112   : > { %v899_v32 = vadd.f32 %v4500_v29, %v898_v31  ;;  %v5060_v34 = vpop.f32.mrb[1].mxu0 }
 0x113   : > { %v901_v37 = vpop.f32.mrb[2].mxu0  ;;  %v5228_v34 = vld [vmem:[%s5576_s23] sm:$0xff]  }
 0x114   : > { %v921_v38 = vmul.f32 0.35355338, %v899_v32  ;;  %v902_v39 = vadd.f32 %v4500_v29, %v901_v37  ;;  %v5061_v41 = vpop.f32.mrb[3].mxu0  ;;  %5171 = vmatpush3.bf16.msra.mxu0 %v5228_v34 }
 0x115   : > { %v984_v33 = vpop.f32.mrb[0].mxu1  ;;  %5172 = vmatprep.subr.bf16.mxu0 %v5432_v7 }
 0x116   : > { %v985_v35 = vadd.f32 %v4506_v30, %v984_v33  ;;  %v5076_v36 = vpop.f32.mrb[1].mxu1  ;;  %v922_v44 = vmul.f32 0.35355338, %v902_v39 }
 0x117   : > { %v987_v40 = vpop.f32.mrb[2].mxu1 }
 0x118   : > { %v5077_v42 = vpop.f32.mrb[3].mxu1  ;;  %v1091_v43 = vmul.f32 %v985_v35, %v921_v38  ;;  %v988_v45 = vadd.f32 %v4506_v30, %v987_v40 }
 0x119   : > { %v906_v47 = vpop.f32.mrb[4].mxu0 }
 0x11a   : > { %v1092_v46 = vmul.f32 %v988_v45, %v922_v44  ;;  %5111 = vmatmul.mubr.msk.f32.vlgmr.msra.gmra.mrb[12].mxu1 %vm854_vm2, %v1091_v43  ;;  %v907_v48 = vadd.f32 %v4500_v29, %v906_v47  ;;  %v5064_v50 = vpop.f32.mrb[5].mxu0 }
 0x11b   : > { %5194 = vmatpush3.bf16.msra.mxu1 %v5656_v16  ;;  %5113 = vmatprep.mubr.msk.f32.mxu1 %vm5433_vm1, %v5432_v7  ;;  %v909_v53 = vpop.f32.mrb[6].mxu0 }
 0x11c   : > { %5195 = vmatprep.subr.bf16.mxu1 %v5434_v21  ;;  %v923_v54 = vmul.f32 0.35355338, %v907_v48  ;;  %v910_v55 = vadd.f32 %v4500_v29, %v909_v53  ;;  %v5065_v57 = vpop.f32.mrb[7].mxu0 }
 0x11d   : > { %v992_v49 = vpop.f32.mrb[4].mxu1 }
 0x11e   : > { %v993_v51 = vadd.f32 %v4506_v30, %v992_v49  ;;  %v5080_v52 = vpop.f32.mrb[5].mxu1  ;;  %5114 = vmatmul.mubr.msk.f32.gmra.mrb[14].mxu1 %vm854_vm2, %v1092_v46  ;;  %v924_v61 = vmul.f32 0.35355338, %v910_v55 }
 0x11f   : > { %v995_v56 = vpop.f32.mrb[6].mxu1  ;;  %5197 = vmatpush3.bf16.msra.mxu1 %v5673_v22  ;;  %5116 = vmatprep.mubr.msk.f32.mxu1 %vm5433_vm1, %v5432_v7 }
 0x120   : > { %v996_v58 = vadd.f32 %v4506_v30, %v995_v56  ;;  %v5081_v59 = vpop.f32.mrb[7].mxu1  ;;  %v1093_v60 = vmul.f32 %v993_v51, %v923_v54  ;;  %5198 = vmatprep.subr.bf16.mxu1 %v5434_v21  ;;  %v1317_v63 = vmul.f32 %v985_v35, %v924_v61  ;;  %v5229_v35 = vld [vmem:[%s5576_s23 + $0x8] sm:$0xff]  }
 0x121   : > { %v914_v1 = vpop.f32.mrb[8].mxu0  ;;  %5173 = vmatpush3.bf16.msra.mxu0 %v5229_v35 }
 0x122   : > { %v1183_v62 = vmul.f32 %v996_v58, %v921_v38  ;;  %v1409_v0 = vmul.f32 %v996_v58, %v924_v61  ;;  %5117 = vmatmul.mubr.msk.f32.gmra.mrb[16].mxu1 %vm854_vm2, %v1093_v60  ;;  %v915_v2 = vadd.f32 %v4500_v29, %v914_v1  ;;  %v5068_v4 = vpop.f32.mrb[9].mxu0  ;;  %v4512_v61 = vld [vmem:[%s6490_s1] ss:$0 sm:$0xff]  ;;  %s6495_s1 = sld [smem:[#allocation16_spill]] (!%p4725_p5) }
 0x123   : > { %5127 = vmatprep.mubr.msk.f32.mxu1 %vm5433_vm1, %v5432_v7  ;;  %v917_v8 = vpop.f32.mrb[10].mxu0 }
 0x124   : > { %v925_v9 = vmul.f32 0.35355338, %v915_v2  ;;  %v918_v10 = vadd.f32 %v4500_v29, %v917_v8  ;;  %v5069_v12 = vpop.f32.mrb[11].mxu0 }
 0x125   : > { %v1000_v3 = vpop.f32.mrb[8].mxu1 }
 0x126   : > { %v1001_v5 = vadd.f32 %v4506_v30, %v1000_v3  ;;  %v5084_v6 = vpop.f32.mrb[9].mxu1  ;;  %5128 = vmatmul.mubr.msk.f32.vlgmr.msra.gmra.mrb[18].mxu1 %vm854_vm2, %v1183_v62  ;;  %v1318_v17 = vmul.f32 %v988_v45, %v925_v9  ;;  %v926_v19 = vmul.f32 0.35355338, %v918_v10 }
 0x127   : > { %v1003_v11 = vpop.f32.mrb[10].mxu1  ;;  %5200 = vmatpush3.bf16.msra.mxu1 %v5656_v16  ;;  %5130 = vmatprep.mubr.msk.f32.mxu1 %vm5433_vm1, %v5432_v7 }
 0x128   : > { %v1184_v13 = vmul.f32 %v1001_v5, %v922_v44  ;;  %v1004_v14 = vadd.f32 %v4506_v30, %v1003_v11  ;;  %v5085_v15 = vpop.f32.mrb[11].mxu1  ;;  %v1410_v18 = vmul.f32 %v1001_v5, %v925_v9  ;;  %5201 = vmatprep.subr.bf16.mxu1 %v5434_v21  ;;  %v1319_v23 = vmul.f32 %v993_v51, %v926_v19 }
 0x12a   : > { %v1185_v20 = vmul.f32 %v1004_v14, %v923_v54  ;;  %v1411_v24 = vmul.f32 %v1004_v14, %v926_v19  ;;  %5131 = vmatmul.mubr.msk.f32.gmra.mrb[20].mxu1 %vm854_vm2, %v1184_v13 }
 0x12b   : > { %5203 = vmatpush3.bf16.msra.mxu1 %v5673_v22  ;;  %5133 = vmatprep.mubr.msk.f32.mxu1 %vm5433_vm1, %v5432_v7 }
 0x12c   : > { %5204 = vmatprep.subr.bf16.mxu1 %v5434_v21 }
 0x12e   : > { %5134 = vmatmul.mubr.msk.f32.gmra.mrb[22].mxu1 %vm854_vm2, %v1185_v20 }
 0x12f   : > { %5144 = vmatprep.mubr.msk.f32.mxu1 %vm5433_vm1, %v5432_v7 }
 0x132   : > { %5145 = vmatmul.mubr.msk.f32.vlgmr.msra.gmra.mrb[24].mxu1 %vm854_vm2, %v1317_v63 }
 0x133   : > { %5206 = vmatpush3.bf16.msra.mxu1 %v5656_v16  ;;  %5147 = vmatprep.mubr.msk.f32.mxu1 %vm5433_vm1, %v5432_v7  ;;  %v1064_v16 = vpop.f32.mrb[12].mxu0 }
 0x134   : > { %5207 = vmatprep.subr.bf16.mxu1 %v5434_v21  ;;  %v5092_v21 = vpop.f32.mrb[13].mxu0  ;;  %v5770_v2 = vadd.f32 %v4512_v61, %v1064_v16 }
 0x136   : > { %5148 = vmatmul.mubr.msk.f32.gmra.mrb[26].mxu1 %vm854_vm2, %v1318_v17 }
 0x137   : > { %5209 = vmatpush3.bf16.msra.mxu1 %v5673_v22  ;;  %5150 = vmatprep.mubr.msk.f32.mxu1 %vm5433_vm1, %v5432_v7  ;;  %v1067_v22 = vpop.f32.mrb[14].mxu0 }
 0x138   : > { %v5093_v25 = vpop.f32.mrb[15].mxu0  ;;  %v5778_v13 = vadd.f32 %v4512_v61, %v1067_v22 }
 0x139   : > { %v5758_v26 = vpop.f32.mrb[16].mxu0 }
 0x13a   : > { %5151 = vmatmul.mubr.msk.f32.gmra.mrb[28].mxu1 %vm854_vm2, %v1319_v23  ;;  %v5096_v27 = vpop.f32.mrb[17].mxu0  ;;  %v5782_v23 = vadd.f32 %v4512_v61, %v5758_v26 }
 0x13b   : > { %5161 = vmatprep.mubr.msk.f32.mxu1 %vm5433_vm1, %v5432_v7  ;;  %v1075_v28 = vpop.f32.mrb[18].mxu0 }
 0x13c   : > { %v5097_v29 = vpop.f32.mrb[19].mxu0  ;;  %v5772_v3 = vadd.f32 %v4512_v61, %v1075_v28 }
 0x13d   : > { %v1080_v30 = vpop.f32.mrb[20].mxu0 }
 0x13e   : > { %5162 = vmatmul.mubr.msk.f32.vlgmr.msra.gmra.mrb[30].mxu1 %vm854_vm2, %v1409_v0  ;;  %v5100_v31 = vpop.f32.mrb[21].mxu0  ;;  %v5776_v12 = vadd.f32 %v4512_v61, %v1080_v30 }
 0x13f   : > { %5164 = vmatprep.mubr.msk.f32.mxu1 %vm5433_vm1, %v5432_v7  ;;  %v5760_v32 = vpop.f32.mrb[22].mxu0 }
 0x140   : > { %v5101_v33 = vpop.f32.mrb[23].mxu0  ;;  %v5786_v21 = vadd.f32 %v4512_v61, %v5760_v32 }
 0x142   : > { %5165 = vmatmul.mubr.msk.f32.gmra.mrb[32].mxu1 %vm854_vm2, %v1410_v18 }
 0x143   : > { %5167 = vmatprep.mubr.msk.f32.mxu1 %vm5433_vm1, %v5432_v7 }
 0x146   : > { %5168 = vmatmul.mubr.msk.f32.gmra.mrb[34].mxu1 %vm854_vm2, %v1411_v24 }
 0x1ed   : > { %v1169_v36 = vpop.f32.mrb[12].mxu1 }
 0x1ee   : > { %v5112_v37 = vpop.f32.mrb[13].mxu1 }
 0x1f1   : > { %v1174_v38 = vpop.f32.mrb[14].mxu1 }
 0x1f2   : > { %v5115_v39 = vpop.f32.mrb[15].mxu1 }
 0x1f5   : > { %v1179_v40 = vpop.f32.mrb[16].mxu1 }
 0x1f6   : > { %v5118_v41 = vpop.f32.mrb[17].mxu1 }
 0x1f9   : > { %v1261_v42 = vpop.f32.mrb[18].mxu1 }
 0x1fa   : > { %v1275_v43 = vmax.f32 %v1169_v36, %v1261_v42  ;;  %v5129_v44 = vpop.f32.mrb[19].mxu1 }
 0x1fc   : > { %v1278_v45 = vsub.f32 %v1169_v36, %v1275_v43  ;;  %v1287_v46 = vsub.f32 %v1261_v42, %v1275_v43 }
 0x1fd   : > { %v1266_v47 = vpop.f32.mrb[20].mxu1 }
 0x1fe   : > { %v1281_v48 = vmul.f32 1.442695, %v1278_v45  ;;  %v1290_v49 = vmul.f32 1.442695, %v1287_v46  ;;  %v1276_v50 = vmax.f32 %v1174_v38, %v1266_v47  ;;  %v5132_v51 = vpop.f32.mrb[21].mxu1 }
 0x200   : > { %5358 = vpow2.f32 %v1281_v48  ;;  %v1279_v52 = vsub.f32 %v1174_v38, %v1276_v50  ;;  %v1288_v53 = vsub.f32 %v1266_v47, %v1276_v50 }
 0x201   : > { %5360 = vpow2.f32 %v1290_v49  ;;  %v1271_v54 = vpop.f32.mrb[22].mxu1 }
 0x202   : > { %v1283_v55 = vmul.f32 1.442695, %v1279_v52  ;;  %v1292_v56 = vmul.f32 1.442695, %v1288_v53  ;;  %v1277_v57 = vmax.f32 %v1179_v40, %v1271_v54  ;;  %v5135_v58 = vpop.f32.mrb[23].mxu1 }
 0x204   : > { %5362 = vpow2.f32 %v1283_v55  ;;  %v1280_v59 = vsub.f32 %v1179_v40, %v1277_v57  ;;  %v1289_v60 = vsub.f32 %v1271_v54, %v1277_v57 }
 0x205   : > { %5364 = vpow2.f32 %v1292_v56  ;;  %v1395_v62 = vpop.f32.mrb[24].mxu1 }
 0x206   : > { %v1285_v63 = vmul.f32 1.442695, %v1280_v59  ;;  %v1294_v0 = vmul.f32 1.442695, %v1289_v60  ;;  %v5146_v1 = vpop.f32.mrb[25].mxu1 }
 0x208   : > { %5366 = vpow2.f32 %v1285_v63 }
 0x209   : > { %5368 = vpow2.f32 %v1294_v0  ;;  %v1400_v4 = vpop.f32.mrb[26].mxu1 }
 0x20a   : > { %v5359_v5 = vpop.eup %5358  ;;  %v5149_v6 = vpop.f32.mrb[27].mxu1 }
 0x20b   : > { %v5361_v8 = vpop.eup %5360  ;;  %v1299_v9 = vmul.f32 %v5359_v5, %v5770_v2 }
 0x20c   : > { %v1296_v10 = vadd.f32 %v5361_v8, %v5359_v5  ;;  %v1302_v11 = vmul.f32 %v5361_v8, %v5772_v3 }
 0x20d   : > { %v1405_v14 = vpop.f32.mrb[28].mxu1 }
 0x20e   : > { %v5363_v15 = vpop.eup %5362  ;;  %5370 = vrcp.f32 %v1296_v10  ;;  %v1305_v17 = vadd.f32 %v1302_v11, %v1299_v9  ;;  %v5152_v18 = vpop.f32.mrb[29].mxu1 }
 0x20f   : > { %v5365_v19 = vpop.eup %5364  ;;  %v1300_v20 = vmul.f32 %v5363_v15, %v5778_v13 }
 0x210   : > { %v1297_v24 = vadd.f32 %v5365_v19, %v5363_v15  ;;  %v1303_v16 = vmul.f32 %v5365_v19, %v5776_v12 }
 0x211   : > { %v1487_v25 = vpop.f32.mrb[30].mxu1 }
 0x212   : > { %v5367_v22 = vpop.eup %5366  ;;  %5372 = vrcp.f32 %v1297_v24  ;;  %v1306_v27 = vadd.f32 %v1303_v16, %v1300_v20  ;;  %v1501_v28 = vmax.f32 %v1395_v62, %v1487_v25  ;;  %v5163_v29 = vpop.f32.mrb[31].mxu1 }
 0x213   : > { %v5369_v30 = vpop.eup %5368  ;;  %v1301_v31 = vmul.f32 %v5367_v22, %v5782_v23  ;;  %v4530_v29 = vld [vmem:[%s6491_s30] ss:$0 sm:$0xff] }
 0x214   : > { %v1298_v33 = vadd.f32 %v5369_v30, %v5367_v22  ;;  %v1304_v34 = vmul.f32 %v5369_v30, %v5786_v21  ;;  %v1504_v26 = vsub.f32 %v1395_v62, %v1501_v28  ;;  %v1513_v35 = vsub.f32 %v1487_v25, %v1501_v28 }
 0x215   : > { %v1492_v36 = vpop.f32.mrb[32].mxu1 }
 0x216   : > { %5374 = vrcp.f32 %v1298_v33  ;;  %v1307_v37 = vadd.f32 %v1304_v34, %v1301_v31  ;;  %v1507_v38 = vmul.f32 1.442695, %v1504_v26  ;;  %v1516_v32 = vmul.f32 1.442695, %v1513_v35  ;;  %v5166_v39 = vpop.f32.mrb[33].mxu1 }
 0x217   : > { %v1502_v40 = vmax.f32 %v1400_v4, %v1492_v36 }
 0x218   : > { %v5371_v41 = vpop.eup %5370  ;;  %5376 = vpow2.f32 %v1507_v38  ;;  %v5419_v38 = vld [vmem:[#allocation2 + $0x8] sm:$0xff] }
 0x219   : > { %v1309_v42 = vmul.f32 %v5371_v41, %v1305_v17  ;;  %5378 = vpow2.f32 %v1516_v32  ;;  %v1505_v43 = vsub.f32 %v1400_v4, %v1502_v40  ;;  %v1514_v44 = vsub.f32 %v1492_v36, %v1502_v40  ;;  %v1497_v45 = vpop.f32.mrb[34].mxu1  ;;  %v5418_v36 = vld [vmem:[#allocation2] sm:$0xff] }
 0x21a   : > { %v1503_v46 = vmax.f32 %v1405_v14, %v1497_v45  ;;  %v5169_v47 = vpop.f32.mrb[35].mxu1 }
 0x21b   : > { %1314 = vst.msk [vmem:[#allocation3] sm:$0xff] %vm854_vm2, %v1309_v42  ;;  %v1509_v48 = vmul.f32 1.442695, %v1505_v43  ;;  %v1518_v49 = vmul.f32 1.442695, %v1514_v44 }
 0x21c   : > { %v5373_v50 = vpop.eup %5372  ;;  %v1506_v51 = vsub.f32 %v1405_v14, %v1503_v46  ;;  %v1515_v52 = vsub.f32 %v1497_v45, %v1503_v46  ;;  %v5420_v46 = vld [vmem:[#allocation2 + $0x10] sm:$0xff] }
 0x21d   : > { %v1311_v53 = vmul.f32 %v5373_v50, %v1306_v27  ;;  %5380 = vpow2.f32 %v1509_v48 }
 0x21e   : > { %5382 = vpow2.f32 %v1518_v49  ;;  %v1511_v54 = vmul.f32 1.442695, %v1506_v51  ;;  %v1520_v55 = vmul.f32 1.442695, %v1515_v52  ;;  %v5421_v49 = vld [vmem:[#allocation2 + $0x18] sm:$0xff] }
 0x21f   : > { %1315 = vst.msk [vmem:[#allocation3 + $0x8] sm:$0xff] %vm854_vm2, %v1311_v53 }
 0x220   : > { %v5375_v56 = vpop.eup %5374  ;;  %5384 = vpow2.f32 %v1511_v54 }
 0x221   : > { %v1313_v57 = vmul.f32 %v5375_v56, %v1307_v37  ;;  %5386 = vpow2.f32 %v1520_v55 }
 0x222   : > { %v5377_v58 = vpop.eup %5376  ;;  %v1543_v0 = vld [vmem:[#allocation3] sm:$0xff] }
 0x223   : > { %v5379_v59 = vpop.eup %5378  ;;  %1316 = vst.msk [vmem:[#allocation3 + $0x10] sm:$0xff] %vm854_vm2, %v1313_v57  ;;  %v1525_v60 = vmul.f32 %v5377_v58, %v5770_v2 }
 0x224   : > { %v1522_v61 = vadd.f32 %v5379_v59, %v5377_v58  ;;  %v1528_v62 = vmul.f32 %v5379_v59, %v5772_v3  ;;  %v5422_v58 = vld [vmem:[#allocation2 + $0x20] sm:$0xff] }
 0x226   : > { %v1531_v63 = vadd.f32 %v1528_v62, %v1525_v60  ;;  %5388 = vrcp.f32 %v1522_v61  ;;  %v1544_v1 = vld [vmem:[#allocation3 + $0x8] sm:$0xff]  ;;  %v5423_v61 = vld [vmem:[#allocation2 + $0x28] sm:$0xff] }
 0x227   : > { %v5381_v4 = vpop.eup %5380  ;;  %v1549_v5 = vpack.c.bf16 %v1544_v1, %v1543_v0 }
 0x228   : > { %v5383_v6 = vpop.eup %5382  ;;  %v1526_v8 = vmul.f32 %v5381_v4, %v5778_v13 }
 0x229   : > { %v1523_v9 = vadd.f32 %v5383_v6, %v5381_v4  ;;  %v1529_v10 = vmul.f32 %v5383_v6, %v5776_v12  ;;  %5175 = vmatmul.mubr.msk.bf16.vlgmr.msra.gmra.mrb[24].mxu0 %vm854_vm2, %v1549_v5 }
 0x22a   : > { %v5385_v11 = vpop.eup %5384  ;;  %5178 = vmatprep.mubr.msk.bf16.mxu0 %vm5433_vm1, %v5432_v7  ;;  %v1545_v25 = vld [vmem:[#allocation3 + $0x10] sm:$0xff] }
 0x22b   : > { %v5387_v2 = vpop.eup %5386  ;;  %v1532_v3 = vadd.f32 %v1529_v10, %v1526_v8  ;;  %5390 = vrcp.f32 %v1523_v9  ;;  %v1527_v14 = vmul.f32 %v5385_v11, %v5782_v23 }
 0x22c   : > { %v1524_v15 = vadd.f32 %v5387_v2, %v5385_v11  ;;  %v1530_v17 = vmul.f32 %v5387_v2, %v5786_v21 }
 0x22e   : > { %v1533_v18 = vadd.f32 %v1530_v17, %v1527_v14  ;;  %5392 = vrcp.f32 %v1524_v15 }
 0x230   : > { %v5389_v13 = vpop.eup %5388 }
 0x231   : > { %v1535_v19 = vmul.f32 %v5389_v13, %v1531_v63 }
 0x233   : > { %1540 = vst.msk [vmem:[#allocation3 + $0x18] sm:$0xff] %vm854_vm2, %v1535_v19 }
 0x235   : > { %v5391_v12 = vpop.eup %5390 }
 0x236   : > { %v1537_v20 = vmul.f32 %v5391_v12, %v1532_v3 }
 0x238   : > { %v5393_v24 = vpop.eup %5392  ;;  %1541 = vst.msk [vmem:[#allocation3 + $0x20] sm:$0xff] %vm854_vm2, %v1537_v20 }
 0x239   : > { %v1539_v16 = vmul.f32 %v5393_v24, %v1533_v18 }
 0x23a   : > { %v1546_v22 = vld [vmem:[#allocation3 + $0x18] sm:$0xff] }
 0x23b   : > { %1542 = vst.msk [vmem:[#allocation3 + $0x28] sm:$0xff] %vm854_vm2, %v1539_v16  ;;  %v1550_v23 = vpack.c.bf16 %v1546_v22, %v1545_v25 }
 0x23d   : > { %5179 = vmatmul.mubr.msk.bf16.gmra.mrb[28].mxu0 %vm854_vm2, %v1550_v23 }
 0x23e   : > { %5182 = vmatprep.mubr.msk.bf16.mxu0 %vm5433_vm1, %v5432_v7 }
 0x23f   : > { %v1547_v21 = vld [vmem:[#allocation3 + $0x20] sm:$0xff] }
 0x242   : > { %v1548_v27 = vld [vmem:[#allocation3 + $0x28] sm:$0xff] }
 0x243   : > { %v1551_v28 = vpack.c.bf16 %v1548_v27, %v1547_v21 }
 0x245   : > { %5183 = vmatmul.mubr.msk.bf16.gmra.mrb[32].mxu0 %vm854_vm2, %v1551_v28 }
 0x2fc   : > { %v1618_v30 = vpop.f32.mrb[24].mxu0 }
 0x2fd   : > { %v1619_v31 = vadd.f32 %v4530_v29, %v1618_v30  ;;  %v5176_v33 = vpop.f32.mrb[25].mxu0 }
 0x2fe   : > { %v1621_v34 = vpop.f32.mrb[26].mxu0  ;;  %v1756_v33 = vld [vmem:[%s5594_s21 + $0x8] sm:$0xff] }
 0x2ff   : > { %v1622_v26 = vadd.f32 %v4530_v29, %v1621_v34  ;;  %v5177_v35 = vpop.f32.mrb[27].mxu0  ;;  %v1641_v37 = vadd.f32 %v5418_v36, %v1619_v31  ;;  %v1764_v34 = vld [vmem:[%s5594_s21 + $0x48] sm:$0xff]  ;;  %v1763_v36 = vld [vmem:[%s5594_s21 + $0x40] sm:$0xff] }
 0x300   : > { %v4541_v35 = vcombine.high %v1756_v33, %v1764_v34 }
 0x301   : > { %v1649_v7 = vsel %vm854_vm2, %v1641_v37, 0.0  ;;  %v1642_v32 = vadd.f32 %v5419_v38, %v1622_v26  ;;  %v1755_v26 = vld [vmem:[%s5594_s21] sm:$0xff] }
 0x302   : > { %1650 = vadd.xlane.f32.xlu0 %v1649_v7  ;;  %v4538_v7 = vcombine.low %v1755_v26, %v1763_v36  ;;  %v4539_v38 = vcombine.high %v1755_v26, %v1763_v36  ;;  %2103 = vmatprep.subr.bf16.mxu0 %v4541_v35 }
 0x303   : > { %v1652_v39 = vsel %vm854_vm2, %v1642_v32, 0.0 }
 0x304   : > { %2040 = vmatprep.subr.bf16.mxu1 %v4539_v38 }
 0x305   : > { %2041 = vmatpush1.bf16.msra.mxu1 %v4538_v7 }
 0x306   : > { %1653 = vadd.xlane.f32.xlu0 %v1652_v39  ;;  %v1780_v39 = vld [vmem:[%s5594_s21 + $0xc8] sm:$0xff] }
 0x310   : > { %v1626_v40 = vpop.f32.mrb[28].mxu0 }
 0x311   : > { %v1627_v41 = vadd.f32 %v4530_v29, %v1626_v40  ;;  %v5180_v42 = vpop.f32.mrb[29].mxu0  ;;  %v1771_v40 = vld [vmem:[%s5594_s21 + $0x80] sm:$0xff] }
 0x312   : > { %v1629_v43 = vpop.f32.mrb[30].mxu0  ;;  %v1779_v42 = vld [vmem:[%s5594_s21 + $0xc0] sm:$0xff] }
 0x313   : > { %v1630_v44 = vadd.f32 %v4530_v29, %v1629_v43  ;;  %v5181_v45 = vpop.f32.mrb[31].mxu0  ;;  %v1643_v47 = vadd.f32 %v5420_v46, %v1627_v41  ;;  %v5435_v46 = vmov 0  }
 0x314   : > { %v4555_v45 = vcombine.high %v1771_v40, %v1779_v42  ;;  %2072 = vmatprep.mubr.bf16.mxu1 %v5435_v46  ;;  %2135 = vmatprep.mubr.bf16.mxu0 %v5435_v46 }
 0x315   : > { %v1655_v48 = vsel %vm854_vm2, %v1643_v47, 0.0  ;;  %v1644_v50 = vadd.f32 %v5421_v49, %v1630_v44  ;;  %v4554_v44 = vcombine.low %v1771_v40, %v1779_v42  ;;  %v1758_v49 = vld [vmem:[%s5594_s21 + $0x18] sm:$0xff] }
 0x316   : > { %1656 = vadd.xlane.f32.xlu1 %v1655_v48  ;;  %2042 = vmatprep.subr.bf16.mxu1 %v4555_v45  ;;  %v1765_v48 = vld [vmem:[%s5594_s21 + $0x50] sm:$0xff] }
 0x317   : > { %v1658_v54 = vsel %vm854_vm2, %v1644_v50, 0.0  ;;  %2043 = vmatpush1.bf16.msra.mxu1 %v4554_v44 }
 0x318   : > { %v1634_v51 = vpop.f32.mrb[32].mxu0 }
 0x319   : > { %v1635_v52 = vadd.f32 %v4530_v29, %v1634_v51  ;;  %v5184_v53 = vpop.f32.mrb[33].mxu0 }
 0x31a   : > { %1659 = vadd.xlane.f32.xlu1 %v1658_v54  ;;  %v1637_v55 = vpop.f32.mrb[34].mxu0 }
 0x31b   : > { %v1638_v56 = vadd.f32 %v4530_v29, %v1637_v55  ;;  %v5185_v57 = vpop.f32.mrb[35].mxu0  ;;  %v1645_v59 = vadd.f32 %v5422_v58, %v1635_v52  ;;  %v1766_v52 = vld [vmem:[%s5594_s21 + $0x58] sm:$0xff] }
 0x31c   : > { %v4544_v53 = vcombine.low %v1758_v49, %v1766_v52  ;;  %v4545_v54 = vcombine.high %v1758_v49, %v1766_v52 }
 0x31d   : > { %v1661_v60 = vsel %vm854_vm2, %v1645_v59, 0.0  ;;  %v1646_v62 = vadd.f32 %v5423_v61, %v1638_v56 }
 0x31e   : > { %1662 = vadd.xlane.f32.xlu0 %v1661_v60 }
 0x31f   : > { %v1664_v63 = vsel %vm854_vm2, %v1646_v62, 0.0 }
 0x320   : > { %1665 = vadd.xlane.f32.xlu1 %v1664_v63  ;;  %v5870_v63 = vld [vmem:[%s6492_s2] ss:$0 sm:$0xff] }
 0x38f   : > { %v1651_v0 = vpop.xlane.xlu0 %1650 }
 0x390   : > { %v1668_v1 = vmul.f32 0.03125, %v1651_v0 }
 0x392   : > { %v5820_v4 = vsub.f32 %v1641_v37, %v1668_v1  ;;  %v4540_v37 = vcombine.low %v1756_v33, %v1764_v34 }
 0x393   : > { %v1654_v5 = vpop.xlane.xlu0 %1653 }
 0x394   : > { %v1669_v6 = vmul.f32 0.03125, %v1654_v5  ;;  %v1680_v8 = vmul.f32 %v5820_v4, %v5820_v4  ;;  %2104 = vmatpush1.bf16.msra.mxu0 %v4540_v37 }
 0x396   : > { %v5824_v9 = vsub.f32 %v1642_v32, %v1669_v6  ;;  %v1686_v10 = vsel %vm854_vm2, %v1680_v8, 0.0  ;;  %v1772_v32 = vld [vmem:[%s5594_s21 + $0x88] sm:$0xff]  ;;  %v5879_v8 = vld [vmem:[%s6493_s0] ss:$0 sm:$0xff] }
 0x397   : > { %1687 = vadd.xlane.f32.xlu0 %v1686_v10  ;;  %v4557_v41 = vcombine.high %v1772_v32, %v1780_v39  ;;  %v4556_v43 = vcombine.low %v1772_v32, %v1780_v39 }
 0x398   : > { %v1681_v11 = vmul.f32 %v5824_v9, %v5824_v9 }
 0x399   : > { %2105 = vmatprep.subr.bf16.mxu0 %v4557_v41 }
 0x39a   : > { %v1689_v2 = vsel %vm854_vm2, %v1681_v11, 0.0  ;;  %2106 = vmatpush1.bf16.msra.mxu0 %v4556_v43 }
 0x39b   : > { %1690 = vadd.xlane.f32.xlu1 %v1689_v2  ;;  %2229 = vmatprep.subr.bf16.mxu0 %v4545_v54  ;;  %v1773_v2 = vld [vmem:[%s5594_s21 + $0x90] sm:$0xff]  ;;  %v1783_v54 = vld [vmem:[%s5594_s21 + $0xe0] sm:$0xff] }
 0x3a3   : > { %v1657_v3 = vpop.xlane.xlu1 %1656 }
 0x3a4   : > { %v1670_v14 = vmul.f32 0.03125, %v1657_v3 }
 0x3a6   : > { %v5830_v15 = vsub.f32 %v1643_v47, %v1670_v14  ;;  %v1757_v47 = vld [vmem:[%s5594_s21 + $0x10] sm:$0xff] }
 0x3a7   : > { %v1660_v17 = vpop.xlane.xlu1 %1659  ;;  %v4543_v51 = vcombine.high %v1757_v47, %v1765_v48 }
 0x3a8   : > { %v1671_v18 = vmul.f32 0.03125, %v1660_v17  ;;  %v1682_v13 = vmul.f32 %v5830_v15, %v5830_v15  ;;  %v1781_v17 = vld [vmem:[%s5594_s21 + $0xd0] sm:$0xff] }
 0x3a9   : > { %2166 = vmatprep.subr.bf16.mxu1 %v4543_v51  ;;  %v4558_v33 = vcombine.low %v1773_v2, %v1781_v17 }
 0x3aa   : > { %v5834_v19 = vsub.f32 %v1644_v50, %v1671_v18  ;;  %v1692_v12 = vsel %vm854_vm2, %v1682_v13, 0.0  ;;  %v4542_v50 = vcombine.low %v1757_v47, %v1765_v48  ;;  %v1774_v18 = vld [vmem:[%s5594_s21 + $0x98] sm:$0xff] }
 0x3ab   : > { %1693 = vadd.xlane.f32.xlu0 %v1692_v12  ;;  %v1663_v20 = vpop.xlane.xlu0 %1662  ;;  %v1782_v13 = vld [vmem:[%s5594_s21 + $0xd8] sm:$0xff] }
 0x3ac   : > { %v1672_v24 = vmul.f32 0.03125, %v1663_v20  ;;  %v1683_v16 = vmul.f32 %v5834_v19, %v5834_v19  ;;  %v4560_v34 = vcombine.low %v1774_v18, %v1782_v13 }
 0x3ad   : > { %v1666_v25 = vpop.xlane.xlu1 %1665 }
 0x3ae   : > { %v5839_v22 = vsub.f32 %v1645_v59, %v1672_v24  ;;  %v1673_v23 = vmul.f32 0.03125, %v1666_v25  ;;  %v1695_v21 = vsel %vm854_vm2, %v1683_v16, 0.0  ;;  %v5897_v24 = vld [vmem:[%s5594_s21 + $0x20] sm:$0xff]  ;;  %v4559_v25 = vcombine.high %v1773_v2, %v1781_v17  ;;  %v1786_v2 = vld [vmem:[%s5594_s21 + $0xf8] sm:$0xff] }
 0x3af   : > { %1696 = vadd.xlane.f32.xlu1 %v1695_v21  ;;  %v5900_v21 = vld [vmem:[%s5594_s21 + $0x60] sm:$0xff] }
 0x3b0   : > { %v5842_v27 = vsub.f32 %v1646_v62, %v1673_v23  ;;  %v1684_v28 = vmul.f32 %v5839_v22, %v5839_v22  ;;  %v4561_v23 = vcombine.high %v1774_v18, %v1782_v13  ;;  %v4547_v35 = vcombine.high %v5897_v24, %v5900_v21 }
 0x3b2   : > { %v1698_v29 = vsel %vm854_vm2, %v1684_v28, 0.0  ;;  %v1685_v30 = vmul.f32 %v5842_v27, %v5842_v27  ;;  %v5903_v28 = vld [vmem:[%s5594_s21 + $0x28] sm:$0xff] }
 0x3b3   : > { %1699 = vadd.xlane.f32.xlu0 %v1698_v29  ;;  %v5906_v29 = vld [vmem:[%s5594_s21 + $0x68] sm:$0xff] }
 0x3b4   : > { %v1701_v31 = vsel %vm854_vm2, %v1685_v30, 0.0  ;;  %v4549_v36 = vcombine.high %v5903_v28, %v5906_v29 }
 0x3b5   : > { %1702 = vadd.xlane.f32.xlu1 %v1701_v31 }
 0x424   : > { %v1688_v55 = vpop.xlane.xlu0 %1687 }
 0x425   : > { %v1704_v56 = vmul.f32 0.03125, %v1688_v55  ;;  %v1776_v55 = vld [vmem:[%s5594_s21 + $0xa8] sm:$0xff] }
 0x427   : > { %v1710_v57 = vadd.f32 1e-05, %v1704_v56  ;;  %v1784_v56 = vld [vmem:[%s5594_s21 + $0xe8] sm:$0xff] }
 0x428   : > { %v1691_v58 = vpop.xlane.xlu1 %1690 }
 0x429   : > { %5394 = vrsqrt.f32 %v1710_v57  ;;  %v1705_v59 = vmul.f32 0.03125, %v1691_v58  ;;  %v4546_v57 = vcombine.low %v5897_v24, %v5900_v21  ;;  %v4548_v58 = vcombine.low %v5903_v28, %v5906_v29  ;;  %v5233_v21 = vld [vmem:[%s5609_s18 + $0x80] sm:$0xff]   ;;  %v5234_v28 = vld [vmem:[%s5609_s18 + $0x48] sm:$0xff]  }
 0x42a   : > { %v5235_v29 = vld [vmem:[%s5609_s18 + $0xc8] sm:$0xff]  }
 0x42b   : > { %v1711_v60 = vadd.f32 1e-05, %v1705_v59 }
 0x42d   : > { %5396 = vrsqrt.f32 %v1711_v60  ;;  %v4565_v60 = vcombine.high %v1776_v55, %v1784_v56 }
 0x433   : > { %v5395_v61 = vpop.eup %5394 }
 0x434   : > { %v1722_v62 = vmul.f32 %v5395_v61, %v5820_v4  ;;  %v1761_v61 = vld [vmem:[%s5594_s21 + $0x30] sm:$0xff] }
 0x436   : > { %v1734_v1 = vmul.f32 %v5870_v63, %v1722_v62  ;;  %v1769_v62 = vld [vmem:[%s5594_s21 + $0x70] sm:$0xff] }
 0x437   : > { %v5397_v0 = vpop.eup %5396 }
 0x438   : > { %v1723_v5 = vmul.f32 %v5397_v0, %v5824_v9  ;;  %v1694_v6 = vpop.xlane.xlu0 %1693  ;;  %v5884_v3 = vadd.f32 %v5879_v8, %v1734_v1  ;;  %v1770_v0 = vld [vmem:[%s5594_s21 + $0x78] sm:$0xff] }
 0x439   : > { %v1706_v4 = vmul.f32 0.03125, %v1694_v6  ;;  %v4551_v6 = vcombine.high %v1761_v61, %v1769_v62 }
 0x43a   : > { %v1735_v10 = vmul.f32 %v5870_v63, %v1723_v5  ;;  %v4564_v5 = vcombine.low %v1776_v55, %v1784_v56  ;;  %v1791_v55 = vlaneseq }
 0x43b   : > { %v1712_v11 = vadd.f32 1e-05, %v1706_v4  ;;  %v1777_v4 = vld [vmem:[%s5594_s21 + $0xb0] sm:$0xff] }
 0x43c   : > { %v5887_v9 = vadd.f32 %v5879_v8, %v1735_v10  ;;  %v1697_v14 = vpop.xlane.xlu1 %1696  ;;  %v1785_v10 = vld [vmem:[%s5594_s21 + $0xf0] sm:$0xff]  ;;  %v6060_v56 = vshrl.u32 %v1791_v55, 7 }
 0x43d   : > { %5398 = vrsqrt.f32 %v1712_v11  ;;  %v1707_v12 = vmul.f32 0.03125, %v1697_v14  ;;  %v1778_v11 = vld [vmem:[%s5594_s21 + $0xb8] sm:$0xff]  ;;  %v4550_v14 = vcombine.low %v1761_v61, %v1769_v62  ;;  %v4567_v18 = vcombine.high %v1777_v4, %v1785_v10 }
 0x43e   : > { %v5894_v20 = vpack.c.bf16 %v5887_v9, %v5884_v3  ;;  %v4569_v13 = vcombine.high %v1778_v11, %v1786_v2  ;;  %v4568_v24 = vcombine.low %v1778_v11, %v1786_v2  ;;  %v1805_v61 = vsub.s32 3, %v6060_v56 }
 0x43f   : > { %v1713_v16 = vadd.f32 1e-05, %v1707_v12  ;;  %v4566_v12 = vcombine.low %v1777_v4, %v1785_v10 }
 0x440   : > { %v1700_v30 = vpop.xlane.xlu0 %1699  ;;  %4570 = vmatmul.mubr.msk.bf16.vlgmr.msra.gmra.mrb[36].mxu1 %vm854_vm2, %v5894_v20  ;;  %4573 = vmatmul.mubr.msk.bf16.vlgmr.msra.gmra.mrb[36].mxu0 %vm854_vm2, %v5894_v20 }
 0x441   : > { %5400 = vrsqrt.f32 %v1713_v16  ;;  %v1708_v31 = vmul.f32 0.03125, %v1700_v30  ;;  %2167 = vmatpush1.bf16.msra.mxu1 %v4542_v50  ;;  %2230 = vmatpush1.bf16.msra.mxu0 %v4544_v53  ;;  %v1775_v53 = vld [vmem:[%s5594_s21 + $0xa0] sm:$0xff]  ;;  %v5236_v30 = vld [vmem:[%s5609_s18 + $0x8] sm:$0xff]  }
 0x442   : > { %v1703_v26 = vpop.xlane.xlu1 %1702  ;;  %2082 = vmatprep.mubr.bf16.mxu1 %v5435_v46  ;;  %2145 = vmatprep.mubr.bf16.mxu0 %v5435_v46  ;;  %v4563_v59 = vcombine.high %v1775_v53, %v1783_v54  ;;  %v4562_v1 = vcombine.low %v1775_v53, %v1783_v54  ;;  %v5230_v16 = vld [vmem:[%s5609_s18 + $0x40] sm:$0xff]  }
 0x443   : > { %v1714_v37 = vadd.f32 1e-05, %v1708_v31  ;;  %v1709_v7 = vmul.f32 0.03125, %v1703_v26  ;;  %2168 = vmatprep.subr.bf16.mxu1 %v4559_v25  ;;  %2231 = vmatprep.subr.bf16.mxu0 %v4561_v23  ;;  %v5231_v25 = vld [vmem:[%s5609_s18 + $0xc0] sm:$0xff]   ;;  %v5237_v31 = vld [vmem:[%s5609_s18 + $0x88] sm:$0xff]   ;;  %v5240_v26 = vld [vmem:[%s5609_s18 + $0x10] sm:$0xff]  }
 0x444   : > { %v5232_v23 = vld [vmem:[%s5609_s18] sm:$0xff]  }
 0x445   : > { %5402 = vrsqrt.f32 %v1714_v37  ;;  %v1715_v38 = vadd.f32 1e-05, %v1709_v7  ;;  %2169 = vmatpush1.bf16.msra.mxu1 %v4558_v33  ;;  %2232 = vmatpush1.bf16.msra.mxu0 %v4560_v34  ;;  %v5238_v33 = vld [vmem:[%s5609_s18 + $0x50] sm:$0xff]   ;;  %v5244_v37 = vld [vmem:[%s5609_s18 + $0x18] sm:$0xff]   ;;  %v5262_v53 = vld [vmem:[%s5609_s18 + $0x140] sm:$0xff]  }
 0x446   : > { %2292 = vmatprep.subr.bf16.mxu1 %v4547_v35  ;;  %2355 = vmatprep.subr.bf16.mxu0 %v4549_v36  ;;  %v5239_v34 = vld [vmem:[%s5609_s18 + $0xd0] sm:$0xff]   ;;  %v5242_v35 = vld [vmem:[%s5609_s18 + $0x58] sm:$0xff]   ;;  %v5263_v54 = vld [vmem:[%s5609_s18 + $0x1c0] sm:$0xff]  }
 0x447   : > { %v5399_v32 = vpop.eup %5398  ;;  %5404 = vrsqrt.f32 %v1715_v38  ;;  %v5243_v36 = vld [vmem:[%s5609_s18 + $0xd8] sm:$0xff]   ;;  %v5246_v38 = vld [vmem:[%s5609_s18 + $0x60] sm:$0xff]  }
 0x448   : > { %v1724_v39 = vmul.f32 %v5399_v32, %v5830_v15  ;;  %v5245_v7 = vld [vmem:[%s5609_s18 + $0x98] sm:$0xff]   ;;  %v5247_v32 = vld [vmem:[%s5609_s18 + $0xe0] sm:$0xff]  }
 0x44a   : > { %v1736_v41 = vmul.f32 %v5870_v63, %v1724_v39  ;;  %v5248_v39 = vld [vmem:[%s5609_s18 + $0x20] sm:$0xff]  }
 0x44b   : > { %v5401_v40 = vpop.eup %5400 }
 0x44c   : > { %v1725_v42 = vmul.f32 %v5401_v40, %v5834_v19  ;;  %v5923_v45 = vadd.f32 %v5879_v8, %v1736_v41  ;;  %v5249_v40 = vld [vmem:[%s5609_s18 + $0xa0] sm:$0xff]   ;;  %v5251_v41 = vld [vmem:[%s5609_s18 + $0xe8] sm:$0xff]  }
 0x44e   : > { %v1737_v43 = vmul.f32 %v5870_v63, %v1725_v42  ;;  %v5252_v42 = vld [vmem:[%s5609_s18 + $0x28] sm:$0xff]  }
 0x44f   : > { %v5403_v44 = vpop.eup %5402 }
 0x450   : > { %v5926_v47 = vadd.f32 %v5879_v8, %v1737_v43  ;;  %v1726_v48 = vmul.f32 %v5403_v44, %v5839_v22  ;;  %v5253_v43 = vld [vmem:[%s5609_s18 + $0xa8] sm:$0xff]   ;;  %v5254_v44 = vld [vmem:[%s5609_s18 + $0x70] sm:$0xff]  }
 0x451   : > { %v5405_v49 = vpop.eup %5404 }
 0x452   : > { %v5931_v15 = vpack.c.bf16 %v5926_v47, %v5923_v45  ;;  %v1727_v19 = vmul.f32 %v5405_v49, %v5842_v27  ;;  %v1738_v50 = vmul.f32 %v5870_v63, %v1726_v48  ;;  %v5255_v48 = vld [vmem:[%s5609_s18 + $0xf0] sm:$0xff]  }
 0x453   : > { %v5256_v49 = vld [vmem:[%s5609_s18 + $0x30] sm:$0xff]  }
 0x454   : > { %v1739_v51 = vmul.f32 %v5870_v63, %v1727_v19  ;;  %4571 = vmatmul.mubr.msk.bf16.gmra.mrb[40].mxu1 %vm854_vm2, %v5931_v15  ;;  %4574 = vmatmul.mubr.msk.bf16.gmra.mrb[40].mxu0 %vm854_vm2, %v5931_v15  ;;  %v5946_v27 = vadd.f32 %v5879_v8, %v1738_v50  ;;  %v1762_v63 = vld [vmem:[%s5594_s21 + $0x38] sm:$0xff] }
 0x455   : > { %2092 = vmatprep.mubr.bf16.mxu1 %v5435_v46  ;;  %2155 = vmatprep.mubr.bf16.mxu0 %v5435_v46  ;;  %v4552_v17 = vcombine.low %v1762_v63, %v1770_v0  ;;  %v5258_v19 = vld [vmem:[%s5609_s18 + $0x78] sm:$0xff]  }
 0x456   : > { %v5943_v22 = vadd.f32 %v5879_v8, %v1739_v51  ;;  %v4553_v8 = vcombine.high %v1762_v63, %v1770_v0  ;;  %v5259_v50 = vld [vmem:[%s5609_s18 + $0xf8] sm:$0xff]  }
 0x457   : > { %v5260_v51 = vld [vmem:[%s5609_s18 + $0x38] sm:$0xff]  }
 0x458   : > { %v5950_v52 = vpack.c.bf16 %v5943_v22, %v5946_v27 }
 0x45c   : > { %4572 = vmatmul.mubr.msk.bf16.gmra.mrb[44].mxu1 %vm854_vm2, %v5950_v52  ;;  %4575 = vmatmul.mubr.msk.bf16.gmra.mrb[44].mxu0 %vm854_vm2, %v5950_v52 }
 0x45d   : > { %2198 = vmatprep.mubr.bf16.mxu1 %v5435_v46  ;;  %2261 = vmatprep.mubr.bf16.mxu0 %v5435_v46 }
 0x464   : > { %4576 = vmatmul.mubr.msk.bf16.vlgmr.msra.gmra.mrb[48].mxu1 %vm854_vm2, %v5894_v20  ;;  %4579 = vmatmul.mubr.msk.bf16.vlgmr.msra.gmra.mrb[48].mxu0 %vm854_vm2, %v5894_v20 }
 0x465   : > { %2208 = vmatprep.mubr.bf16.mxu1 %v5435_v46  ;;  %2271 = vmatprep.mubr.bf16.mxu0 %v5435_v46 }
 0x466   : > { %2293 = vmatpush1.bf16.msra.mxu1 %v4546_v57  ;;  %2356 = vmatpush1.bf16.msra.mxu0 %v4548_v58  ;;  %v1793_v57 = vsub.s32 0, %v6060_v56  ;;  %v1801_v58 = vsub.s32 2, %v6060_v56 }
 0x467   : > { %2294 = vmatprep.subr.bf16.mxu1 %v4563_v59  ;;  %2357 = vmatprep.subr.bf16.mxu0 %v4565_v60  ;;  %v6065_v59 = vld [vmem:[%s5599_s8] sm:$0xff]  ;;  %v1797_v60 = vsub.s32 1, %v6060_v56 }
 0x468   : > { %v6072_v62 = vrot.slane %v6065_v59, %v1793_v57  ;;  %v6077_v63 = vrot.slane %v6065_v59, %v1801_v58 }
 0x469   : > { %v6082_v0 = vrot.slane %v6065_v59, %v1797_v60 }
 0x46a   : > { %2295 = vmatpush1.bf16.msra.mxu1 %v4562_v1  ;;  %2358 = vmatpush1.bf16.msra.mxu0 %v4564_v5  ;;  %v6087_v1 = vrot.slane %v6065_v59, %v1805_v61 }
 0x46b   : > { %2418 = vmatprep.subr.bf16.mxu1 %v4551_v6  ;;  %2481 = vmatprep.subr.bf16.mxu0 %v4553_v8 }
 0x46c   : > { %4577 = vmatmul.mubr.msk.bf16.gmra.mrb[52].mxu1 %vm854_vm2, %v5931_v15  ;;  %4580 = vmatmul.mubr.msk.bf16.gmra.mrb[52].mxu0 %vm854_vm2, %v5931_v15 }
 0x46d   : > { %2218 = vmatprep.mubr.bf16.mxu1 %v5435_v46  ;;  %2281 = vmatprep.mubr.bf16.mxu0 %v5435_v46 }
 0x474   : > { %4578 = vmatmul.mubr.msk.bf16.gmra.mrb[56].mxu1 %vm854_vm2, %v5950_v52  ;;  %4581 = vmatmul.mubr.msk.bf16.gmra.mrb[56].mxu0 %vm854_vm2, %v5950_v52 }
 0x475   : > { %2324 = vmatprep.mubr.bf16.mxu1 %v5435_v46  ;;  %2387 = vmatprep.mubr.bf16.mxu0 %v5435_v46 }
 0x47c   : > { %4582 = vmatmul.mubr.msk.bf16.vlgmr.msra.gmra.mrb[60].mxu1 %vm854_vm2, %v5894_v20  ;;  %4585 = vmatmul.mubr.msk.bf16.vlgmr.msra.gmra.mrb[60].mxu0 %vm854_vm2, %v5894_v20 }
 0x47d   : > { %2334 = vmatprep.mubr.bf16.mxu1 %v5435_v46  ;;  %2397 = vmatprep.mubr.bf16.mxu0 %v5435_v46 }
 0x47e   : > { %2419 = vmatpush1.bf16.msra.mxu1 %v4550_v14  ;;  %2482 = vmatpush1.bf16.msra.mxu0 %v4552_v17 }
 0x47f   : > { %2420 = vmatprep.subr.bf16.mxu1 %v4567_v18  ;;  %2483 = vmatprep.subr.bf16.mxu0 %v4569_v13 }
 0x482   : > { %2421 = vmatpush1.bf16.msra.mxu1 %v4566_v12  ;;  %2484 = vmatpush1.bf16.msra.mxu0 %v4568_v24 }
 0x483   : > { %4782 = vmatprep.subr.bf16.mxu1 %v5230_v16  ;;  %4816 = vmatprep.subr.bf16.mxu0 %v5231_v25 }
 0x484   : > { %4583 = vmatmul.mubr.msk.bf16.gmra.mrb[64].mxu1 %vm854_vm2, %v5931_v15  ;;  %4586 = vmatmul.mubr.msk.bf16.gmra.mrb[64].mxu0 %vm854_vm2, %v5931_v15 }
 0x485   : > { %2344 = vmatprep.mubr.bf16.mxu1 %v5435_v46  ;;  %2407 = vmatprep.mubr.bf16.mxu0 %v5435_v46 }
 0x48c   : > { %4584 = vmatmul.mubr.msk.bf16.gmra.mrb[68].mxu1 %vm854_vm2, %v5950_v52  ;;  %4587 = vmatmul.mubr.msk.bf16.gmra.mrb[68].mxu0 %vm854_vm2, %v5950_v52 }
 0x48d   : > { %2450 = vmatprep.mubr.bf16.mxu1 %v5435_v46  ;;  %2513 = vmatprep.mubr.bf16.mxu0 %v5435_v46 }
 0x494   : > { %4588 = vmatmul.mubr.msk.bf16.vlgmr.msra.gmra.mrb[72].mxu1 %vm854_vm2, %v5894_v20  ;;  %4591 = vmatmul.mubr.msk.bf16.vlgmr.msra.gmra.mrb[72].mxu0 %vm854_vm2, %v5894_v20  ;;  %v5241_v20 = vld [vmem:[%s5609_s18 + $0x90] sm:$0xff]  }
 0x495   : > { %2460 = vmatprep.mubr.bf16.mxu1 %v5435_v46  ;;  %2523 = vmatprep.mubr.bf16.mxu0 %v5435_v46 }
 0x496   : > { %4783 = vmatpush3.bf16.msra.mxu1 %v5232_v23  ;;  %4817 = vmatpush3.bf16.msra.mxu0 %v5233_v21 }
 0x497   : > { %4784 = vmatprep.subr.bf16.mxu1 %v5234_v28  ;;  %4818 = vmatprep.subr.bf16.mxu0 %v5235_v29 }
 0x49a   : > { %4785 = vmatpush3.bf16.msra.mxu1 %v5236_v30  ;;  %4819 = vmatpush3.bf16.msra.mxu0 %v5237_v31 }
 0x49b   : > { %4786 = vmatprep.subr.bf16.mxu1 %v5238_v33  ;;  %4820 = vmatprep.subr.bf16.mxu0 %v5239_v34 }
 0x49c   : > { %4589 = vmatmul.mubr.msk.bf16.gmra.mrb[76].mxu1 %vm854_vm2, %v5931_v15  ;;  %4592 = vmatmul.mubr.msk.bf16.gmra.mrb[76].mxu0 %vm854_vm2, %v5931_v15  ;;  %v5257_v15 = vld [vmem:[%s5609_s18 + $0xb0] sm:$0xff]  }
 0x49d   : > { %2470 = vmatprep.mubr.bf16.mxu1 %v5435_v46  ;;  %2533 = vmatprep.mubr.bf16.mxu0 %v5435_v46  ;;  %v5250_v46 = vld [vmem:[%s5609_s18 + $0x68] sm:$0xff]  }
 0x49e   : > { %4787 = vmatpush3.bf16.msra.mxu1 %v5240_v26  ;;  %4821 = vmatpush3.bf16.msra.mxu0 %v5241_v20 }
 0x49f   : > { %4788 = vmatprep.subr.bf16.mxu1 %v5242_v35  ;;  %4822 = vmatprep.subr.bf16.mxu0 %v5243_v36 }
 0x4a2   : > { %4789 = vmatpush3.bf16.msra.mxu1 %v5244_v37  ;;  %4823 = vmatpush3.bf16.msra.mxu0 %v5245_v7  ;;  %v5264_v7 = vld [vmem:[%s5609_s18 + $0x100] sm:$0xff]  }
 0x4a3   : > { %4790 = vmatprep.subr.bf16.mxu1 %v5246_v38  ;;  %4824 = vmatprep.subr.bf16.mxu0 %v5247_v32  ;;  %v5265_v38 = vld [vmem:[%s5609_s18 + $0x180] sm:$0xff]   ;;  %v5266_v32 = vld [vmem:[%s5609_s18 + $0x148] sm:$0xff]  }
 0x4a4   : > { %4590 = vmatmul.mubr.msk.bf16.gmra.mrb[80].mxu1 %vm854_vm2, %v5950_v52  ;;  %4593 = vmatmul.mubr.msk.bf16.gmra.mrb[80].mxu0 %vm854_vm2, %v5950_v52  ;;  %v5261_v52 = vld [vmem:[%s5609_s18 + $0xb8] sm:$0xff]  }
 0x4a6   : > { %4791 = vmatpush3.bf16.msra.mxu1 %v5248_v39  ;;  %4825 = vmatpush3.bf16.msra.mxu0 %v5249_v40  ;;  %v5267_v39 = vld [vmem:[%s5609_s18 + $0x1c8] sm:$0xff]  }
 0x4a7   : > { %4792 = vmatprep.subr.bf16.mxu1 %v5250_v46  ;;  %4826 = vmatprep.subr.bf16.mxu0 %v5251_v41  ;;  %v5268_v40 = vld [vmem:[%s5609_s18 + $0x108] sm:$0xff]   ;;  %v5270_v41 = vld [vmem:[%s5609_s18 + $0x150] sm:$0xff]  }
 0x4a8   : > { %v5269_v46 = vld [vmem:[%s5609_s18 + $0x188] sm:$0xff]  }
 0x4aa   : > { %4793 = vmatpush3.bf16.msra.mxu1 %v5252_v42  ;;  %4827 = vmatpush3.bf16.msra.mxu0 %v5253_v43  ;;  %v5271_v42 = vld [vmem:[%s5609_s18 + $0x1d0] sm:$0xff]  }
 0x4ab   : > { %4794 = vmatprep.subr.bf16.mxu1 %v5254_v44  ;;  %4828 = vmatprep.subr.bf16.mxu0 %v5255_v48  ;;  %v5272_v43 = vld [vmem:[%s5609_s18 + $0x110] sm:$0xff]   ;;  %v5274_v48 = vld [vmem:[%s5609_s18 + $0x158] sm:$0xff]  }
 0x4ac   : > { %v5273_v44 = vld [vmem:[%s5609_s18 + $0x190] sm:$0xff]  }
 0x4ae   : > { %4795 = vmatpush3.bf16.msra.mxu1 %v5256_v49  ;;  %4829 = vmatpush3.bf16.msra.mxu0 %v5257_v15  ;;  %v5275_v49 = vld [vmem:[%s5609_s18 + $0x1d8] sm:$0xff]  }
 0x4af   : > { %4796 = vmatprep.subr.bf16.mxu1 %v5258_v19  ;;  %4830 = vmatprep.subr.bf16.mxu0 %v5259_v50  ;;  %v5276_v50 = vld [vmem:[%s5609_s18 + $0x118] sm:$0xff]  }
 0x4b2   : > { %4797 = vmatpush3.bf16.msra.mxu1 %v5260_v51  ;;  %4831 = vmatpush3.bf16.msra.mxu0 %v5261_v52  ;;  %v5277_v51 = vld [vmem:[%s5609_s18 + $0x198] sm:$0xff]  }
 0x4b3   : > { %4850 = vmatprep.subr.bf16.mxu1 %v5262_v53  ;;  %4884 = vmatprep.subr.bf16.mxu0 %v5263_v54 }
 0x513   : > { %v2074_v5 = vpop.f32.mrb[36].mxu1  ;;  %v2137_v6 = vpop.f32.mrb[36].mxu0 }
 0x514   : > { %v2075_v8 = vadd.f32 %v2074_v5, %v6072_v62  ;;  %v2138_v4 = vadd.f32 %v2137_v6, %v6077_v63  ;;  %v2076_v10 = vpop.f32.mrb[37].mxu1  ;;  %v2139_v11 = vpop.f32.mrb[37].mxu0  ;;  %v5278_v5 = vld [vmem:[%s5609_s18 + $0x160] sm:$0xff]  }
 0x515   : > { %v2077_v2 = vadd.f32 %v2076_v10, %v6082_v0  ;;  %v2140_v14 = vadd.f32 %v2139_v11, %v6087_v1  ;;  %v2078_v17 = vpop.f32.mrb[38].mxu1  ;;  %v2141_v18 = vpop.f32.mrb[38].mxu0  ;;  %v5279_v6 = vld [vmem:[%s5609_s18 + $0x1e0] sm:$0xff]  }
 0x516   : > { %v2079_v13 = vadd.f32 %v2078_v17, %v6072_v62  ;;  %v2142_v12 = vadd.f32 %v2141_v18, %v6077_v63  ;;  %v2080_v24 = vpop.f32.mrb[39].mxu1  ;;  %v2143_v16 = vpop.f32.mrb[39].mxu0  ;;  %v2544_v21 = vmax.f32 %v2075_v8, 0.0  ;;  %v2546_v28 = vmax.f32 %v2138_v4, 0.0 }
 0x517   : > { %v2081_v25 = vadd.f32 %v2080_v24, %v6082_v0  ;;  %v2144_v23 = vadd.f32 %v2143_v16, %v6087_v1  ;;  %v2545_v31 = vmax.f32 %v2077_v2, 0.0  ;;  %v2547_v33 = vmax.f32 %v2140_v14, 0.0  ;;  %v5280_v24 = vld [vmem:[%s5609_s18 + $0x120] sm:$0xff]  }
 0x518   : > { %v2560_v29 = vmax.f32 %v2079_v13, 0.0  ;;  %v2562_v30 = vmax.f32 %v2142_v12, 0.0  ;;  %v5281_v16 = vld [vmem:[%s5609_s18 + $0x1a0] sm:$0xff]  }
 0x519   : > { %v2561_v34 = vmax.f32 %v2081_v25, 0.0  ;;  %v2563_v26 = vmax.f32 %v2144_v23, 0.0  ;;  %v1809_v25 = vsub.s32 4, %v6060_v56  ;;  %v1817_v23 = vsub.s32 6, %v6060_v56 }
 0x51a   : > { %v2640_v20 = vpack.c.bf16 %v2560_v29, %v2544_v21  ;;  %v2642_v35 = vpack.c.bf16 %v2562_v30, %v2546_v28 }
 0x51b   : > { %v2641_v36 = vpack.c.bf16 %v2561_v34, %v2545_v31  ;;  %v2643_v37 = vpack.c.bf16 %v2563_v26, %v2547_v33  ;;  %v5282_v31 = vld [vmem:[%s5609_s18 + $0x168] sm:$0xff]  }
 0x51c   : > { %v5283_v33 = vld [vmem:[%s5609_s18 + $0x1e8] sm:$0xff]  }
 0x51d   : > { %3751 = vmatprep.mubr.bf16.mxu1 %v2641_v36  ;;  %3808 = vmatprep.mubr.bf16.mxu0 %v2643_v37 }
 0x51e   : > { %3752 = vmatmul.mubr.bf16.vlgmr.msra.gmra.mrb[84].mxu1 %v2640_v20  ;;  %3809 = vmatmul.mubr.bf16.vlgmr.msra.gmra.mrb[84].mxu0 %v2642_v35 }
 0x51f   : > { %4851 = vmatpush3.bf16.msra.mxu1 %v5264_v7  ;;  %4885 = vmatpush3.bf16.msra.mxu0 %v5265_v38  ;;  %v1813_v7 = vsub.s32 5, %v6060_v56 }
 0x520   : > { %4852 = vmatprep.subr.bf16.mxu1 %v5266_v32  ;;  %4886 = vmatprep.subr.bf16.mxu0 %v5267_v39 }
 0x523   : > { %4853 = vmatpush3.bf16.msra.mxu1 %v5268_v40  ;;  %4887 = vmatpush3.bf16.msra.mxu0 %v5269_v46  ;;  %v5284_v46 = vld [vmem:[%s5609_s18 + $0x128] sm:$0xff]  }
 0x524   : > { %4854 = vmatprep.subr.bf16.mxu1 %v5270_v41  ;;  %4888 = vmatprep.subr.bf16.mxu0 %v5271_v42  ;;  %v5285_v41 = vld [vmem:[%s5609_s18 + $0x1a8] sm:$0xff]   ;;  %v1821_v42 = vsub.s32 7, %v6060_v56  ;;  %v5334_v56 = vld [vmem:[%s5609_s18 + $0x350] sm:$0xff]  }
 0x527   : > { %v2084_v15 = vpop.f32.mrb[40].mxu1  ;;  %v2147_v19 = vpop.f32.mrb[40].mxu0  ;;  %4855 = vmatpush3.bf16.msra.mxu1 %v5272_v43  ;;  %4889 = vmatpush3.bf16.msra.mxu0 %v5273_v44 }
 0x528   : > { %v2085_v52 = vadd.f32 %v2084_v15, %v6072_v62  ;;  %v2148_v53 = vadd.f32 %v2147_v19, %v6077_v63  ;;  %v2086_v54 = vpop.f32.mrb[41].mxu1  ;;  %v2149_v55 = vpop.f32.mrb[41].mxu0  ;;  %4856 = vmatprep.subr.bf16.mxu1 %v5274_v48  ;;  %4890 = vmatprep.subr.bf16.mxu0 %v5275_v49  ;;  %v6136_v15 = vrot.slane %v6065_v59, %v1809_v25  ;;  %v5286_v19 = vld [vmem:[%s5609_s18 + $0x170] sm:$0xff]  }
 0x529   : > { %v2087_v8 = vadd.f32 %v2086_v54, %v6082_v0  ;;  %v2150_v4 = vadd.f32 %v2149_v55, %v6087_v1  ;;  %v2088_v10 = vpop.f32.mrb[42].mxu1  ;;  %v2151_v11 = vpop.f32.mrb[42].mxu0  ;;  %v6145_v55 = vrot.slane %v6065_v59, %v1817_v23 }
 0x52a   : > { %v2089_v2 = vadd.f32 %v2088_v10, %v6072_v62  ;;  %v2152_v14 = vadd.f32 %v2151_v11, %v6077_v63  ;;  %v2090_v17 = vpop.f32.mrb[43].mxu1  ;;  %v2153_v18 = vpop.f32.mrb[43].mxu0  ;;  %v2576_v21 = vmax.f32 %v2085_v52, 0.0  ;;  %v2578_v28 = vmax.f32 %v2148_v53, 0.0 }
 0x52b   : > { %v2091_v13 = vadd.f32 %v2090_v17, %v6082_v0  ;;  %v2154_v12 = vadd.f32 %v2153_v18, %v6087_v1  ;;  %4857 = vmatpush3.bf16.msra.mxu1 %v5276_v50  ;;  %4891 = vmatpush3.bf16.msra.mxu0 %v5277_v51  ;;  %v2577_v34 = vmax.f32 %v2087_v8, 0.0  ;;  %v2579_v26 = vmax.f32 %v2150_v4, 0.0  ;;  %v5287_v50 = vld [vmem:[%s5609_s18 + $0x1f0] sm:$0xff]  }
 0x52c   : > { %v2592_v29 = vmax.f32 %v2089_v2, 0.0  ;;  %v2594_v30 = vmax.f32 %v2152_v14, 0.0  ;;  %4858 = vmatprep.subr.bf16.mxu1 %v5278_v5  ;;  %4892 = vmatprep.subr.bf16.mxu0 %v5279_v6  ;;  %v6152_v10 = vrot.slane %v6065_v59, %v1813_v7  ;;  %v5289_v14 = vld [vmem:[%s5609_s18 + $0x1b0] sm:$0xff]  }
 0x52d   : > { %v2593_v20 = vmax.f32 %v2091_v13, 0.0  ;;  %v2595_v35 = vmax.f32 %v2154_v12, 0.0 }
 0x52e   : > { %v2656_v36 = vpack.c.bf16 %v2592_v29, %v2576_v21  ;;  %v2658_v37 = vpack.c.bf16 %v2594_v30, %v2578_v28 }
 0x52f   : > { %v2657_v38 = vpack.c.bf16 %v2593_v20, %v2577_v34  ;;  %v2659_v32 = vpack.c.bf16 %v2595_v35, %v2579_v26  ;;  %v2094_v39 = vpop.f32.mrb[44].mxu1  ;;  %v2157_v40 = vpop.f32.mrb[44].mxu0  ;;  %4859 = vmatpush3.bf16.msra.mxu1 %v5280_v24  ;;  %4893 = vmatpush3.bf16.msra.mxu0 %v5281_v16  ;;  %v5291_v24 = vld [vmem:[%s5609_s18 + $0x1f8] sm:$0xff]  }
 0x530   : > { %v2095_v43 = vadd.f32 %v2094_v39, %v6072_v62  ;;  %v2158_v44 = vadd.f32 %v2157_v40, %v6077_v63  ;;  %v2096_v48 = vpop.f32.mrb[45].mxu1  ;;  %v2159_v49 = vpop.f32.mrb[45].mxu0  ;;  %4860 = vmatprep.subr.bf16.mxu1 %v5282_v31  ;;  %4894 = vmatprep.subr.bf16.mxu0 %v5283_v33  ;;  %v5292_v26 = vld [vmem:[%s5609_s18 + $0x138] sm:$0xff]   ;;  %v5295_v39 = vld [vmem:[%s5609_s18 + $0x2c0] sm:$0xff]  }
 0x531   : > { %v2097_v51 = vadd.f32 %v2096_v48, %v6082_v0  ;;  %v2160_v52 = vadd.f32 %v2159_v49, %v6087_v1  ;;  %v2098_v53 = vpop.f32.mrb[46].mxu1  ;;  %v2161_v54 = vpop.f32.mrb[46].mxu0  ;;  %3759 = vmatprep.mubr.bf16.mxu1 %v2657_v38  ;;  %3816 = vmatprep.mubr.bf16.mxu0 %v2659_v32  ;;  %v5293_v20 = vld [vmem:[%s5609_s18 + $0x1b8] sm:$0xff]   ;;  %v5294_v32 = vld [vmem:[%s5609_s18 + $0x240] sm:$0xff]  }
 0x532   : > { %v2099_v5 = vadd.f32 %v2098_v53, %v6072_v62  ;;  %v2162_v6 = vadd.f32 %v2161_v54, %v6077_v63  ;;  %v2100_v8 = vpop.f32.mrb[47].mxu1  ;;  %v2163_v4 = vpop.f32.mrb[47].mxu0  ;;  %3760 = vmatmul.mubr.bf16.gmra.mrb[88].mxu1 %v2656_v36  ;;  %3817 = vmatmul.mubr.bf16.gmra.mrb[88].mxu0 %v2658_v37  ;;  %v6159_v62 = vrot.slane %v6065_v59, %v1821_v42  ;;  %v5288_v63 = vld [vmem:[%s5609_s18 + $0x130] sm:$0xff]   ;;  %v2608_v17 = vmax.f32 %v2095_v43, 0.0 }
 0x533   : > { %v2101_v11 = vadd.f32 %v2100_v8, %v6082_v0  ;;  %v2164_v2 = vadd.f32 %v2163_v4, %v6087_v1  ;;  %4861 = vmatpush3.bf16.msra.mxu1 %v5284_v46  ;;  %4895 = vmatpush3.bf16.msra.mxu0 %v5285_v41  ;;  %v2610_v18 = vmax.f32 %v2158_v44, 0.0  ;;  %v5290_v0 = vld [vmem:[%s5609_s18 + $0x178] sm:$0xff]   ;;  %v2609_v1 = vmax.f32 %v2097_v51, 0.0 }
 0x534   : > { %v2624_v13 = vmax.f32 %v2099_v5, 0.0  ;;  %v2626_v12 = vmax.f32 %v2162_v6, 0.0  ;;  %4862 = vmatprep.subr.bf16.mxu1 %v5286_v19  ;;  %4896 = vmatprep.subr.bf16.mxu0 %v5287_v50  ;;  %v2611_v16 = vmax.f32 %v2160_v52, 0.0 }
 0x535   : > { %v2625_v21 = vmax.f32 %v2101_v11, 0.0  ;;  %v2627_v28 = vmax.f32 %v2164_v2, 0.0 }
 0x536   : > { %v2672_v29 = vpack.c.bf16 %v2624_v13, %v2608_v17  ;;  %v2674_v59 = vpack.c.bf16 %v2626_v12, %v2610_v18  ;;  %v5296_v12 = vld [vmem:[%s5609_s18 + $0x200] sm:$0xff]  }
 0x537   : > { %v2673_v30 = vpack.c.bf16 %v2625_v21, %v2609_v1  ;;  %v2675_v31 = vpack.c.bf16 %v2627_v28, %v2611_v16  ;;  %v2200_v33 = vpop.f32.mrb[48].mxu1  ;;  %v2263_v34 = vpop.f32.mrb[48].mxu0  ;;  %4863 = vmatpush3.bf16.msra.mxu1 %v5288_v63  ;;  %4897 = vmatpush3.bf16.msra.mxu0 %v5289_v14  ;;  %v5298_v28 = vld [vmem:[%s5609_s18 + $0x248] sm:$0xff]  }
 0x538   : > { %v2201_v35 = vadd.f32 %v2200_v33, %v6136_v15  ;;  %v2264_v36 = vadd.f32 %v2263_v34, %v6145_v55  ;;  %v2202_v37 = vpop.f32.mrb[49].mxu1  ;;  %v2265_v38 = vpop.f32.mrb[49].mxu0  ;;  %4864 = vmatprep.subr.bf16.mxu1 %v5290_v0  ;;  %4898 = vmatprep.subr.bf16.mxu0 %v5291_v24  ;;  %v5297_v0 = vld [vmem:[%s5609_s18 + $0x280] sm:$0xff]  }
 0x539   : > { %v2203_v40 = vadd.f32 %v2202_v37, %v6152_v10  ;;  %v2266_v46 = vadd.f32 %v2265_v38, %v6159_v62  ;;  %v2204_v41 = vpop.f32.mrb[50].mxu1  ;;  %v2267_v43 = vpop.f32.mrb[50].mxu0  ;;  %3767 = vmatprep.mubr.bf16.mxu1 %v2673_v30  ;;  %3824 = vmatprep.mubr.bf16.mxu0 %v2675_v31  ;;  %v5300_v38 = vld [vmem:[%s5609_s18 + $0x208] sm:$0xff]  }
 0x53a   : > { %v2205_v44 = vadd.f32 %v2204_v41, %v6136_v15  ;;  %v2268_v48 = vadd.f32 %v2267_v43, %v6145_v55  ;;  %v2206_v49 = vpop.f32.mrb[51].mxu1  ;;  %v2269_v19 = vpop.f32.mrb[51].mxu0  ;;  %3768 = vmatmul.mubr.bf16.gmra.mrb[92].mxu1 %v2672_v29  ;;  %3825 = vmatmul.mubr.bf16.gmra.mrb[92].mxu0 %v2674_v59  ;;  %v2548_v52 = vmax.f32 %v2201_v35, 0.0  ;;  %v2550_v53 = vmax.f32 %v2264_v36, 0.0  ;;  %v5299_v29 = vld [vmem:[%s5609_s18 + $0x2c8] sm:$0xff]   ;;  %v5302_v43 = vld [vmem:[%s5609_s18 + $0x250] sm:$0xff]  }
 0x53b   : > { %v2207_v50 = vadd.f32 %v2206_v49, %v6152_v10  ;;  %v2270_v51 = vadd.f32 %v2269_v19, %v6159_v62  ;;  %4865 = vmatpush3.bf16.msra.mxu1 %v5292_v26  ;;  %4899 = vmatpush3.bf16.msra.mxu0 %v5293_v20  ;;  %v2549_v6 = vmax.f32 %v2203_v40, 0.0  ;;  %v2551_v8 = vmax.f32 %v2266_v46, 0.0 }
 0x53c   : > { %v2564_v54 = vmax.f32 %v2205_v44, 0.0  ;;  %v2566_v5 = vmax.f32 %v2268_v48, 0.0  ;;  %4918 = vmatprep.subr.bf16.mxu1 %v5294_v32  ;;  %4952 = vmatprep.subr.bf16.mxu0 %v5295_v39  ;;  %v5301_v32 = vld [vmem:[%s5609_s18 + $0x288] sm:$0xff]   ;;  %v5303_v44 = vld [vmem:[%s5609_s18 + $0x2d0] sm:$0xff]  }
 0x53d   : > { %v2565_v4 = vmax.f32 %v2207_v50, 0.0  ;;  %v2567_v11 = vmax.f32 %v2270_v51, 0.0  ;;  %v6194_v51 = vld [vmem:[%s5599_s8 + $0x8] sm:$0xff] }
 0x53e   : > { %v2644_v2 = vpack.c.bf16 %v2564_v54, %v2548_v52  ;;  %v2646_v63 = vpack.c.bf16 %v2566_v5, %v2550_v53 }
 0x53f   : > { %v2645_v14 = vpack.c.bf16 %v2565_v4, %v2549_v6  ;;  %v2647_v17 = vpack.c.bf16 %v2567_v11, %v2551_v8  ;;  %v2210_v18 = vpop.f32.mrb[52].mxu1  ;;  %v2273_v13 = vpop.f32.mrb[52].mxu0  ;;  %v5304_v4 = vld [vmem:[%s5609_s18 + $0x210] sm:$0xff]  }
 0x540   : > { %v2211_v24 = vadd.f32 %v2210_v18, %v6136_v15  ;;  %v2274_v1 = vadd.f32 %v2273_v13, %v6145_v55  ;;  %v2212_v16 = vpop.f32.mrb[53].mxu1  ;;  %v2275_v21 = vpop.f32.mrb[53].mxu0  ;;  %v5305_v11 = vld [vmem:[%s5609_s18 + $0x290] sm:$0xff]   ;;  %v5306_v18 = vld [vmem:[%s5609_s18 + $0x258] sm:$0xff]  }
 0x541   : > { %v2213_v59 = vadd.f32 %v2212_v16, %v6152_v10  ;;  %v2276_v30 = vadd.f32 %v2275_v21, %v6159_v62  ;;  %v2214_v31 = vpop.f32.mrb[54].mxu1  ;;  %v2277_v33 = vpop.f32.mrb[54].mxu0  ;;  %3865 = vmatprep.mubr.bf16.mxu1 %v2645_v14  ;;  %3922 = vmatprep.mubr.bf16.mxu0 %v2647_v17  ;;  %v5307_v13 = vld [vmem:[%s5609_s18 + $0x2d8] sm:$0xff]   ;;  %v6212_v21 = vrot.slane %v6194_v51, %v1801_v58 }
 0x542   : > { %v2215_v34 = vadd.f32 %v2214_v31, %v6136_v15  ;;  %v2278_v26 = vadd.f32 %v2277_v33, %v6145_v55  ;;  %v2216_v20 = vpop.f32.mrb[55].mxu1  ;;  %v2279_v35 = vpop.f32.mrb[55].mxu0  ;;  %3866 = vmatmul.mubr.bf16.vlgmr.msra.gmra.mrb[96].mxu1 %v2644_v2  ;;  %3923 = vmatmul.mubr.bf16.vlgmr.msra.gmra.mrb[96].mxu0 %v2646_v63  ;;  %v2580_v39 = vmax.f32 %v2211_v24, 0.0  ;;  %v2582_v40 = vmax.f32 %v2274_v1, 0.0  ;;  %v5309_v33 = vld [vmem:[%s5609_s18 + $0x298] sm:$0xff]  }
 0x543   : > { %v2217_v36 = vadd.f32 %v2216_v20, %v6152_v10  ;;  %v2280_v37 = vadd.f32 %v2279_v35, %v6159_v62  ;;  %4919 = vmatpush3.bf16.msra.mxu1 %v5296_v12  ;;  %4953 = vmatpush3.bf16.msra.mxu0 %v5297_v0  ;;  %v2581_v48 = vmax.f32 %v2213_v59, 0.0  ;;  %v2583_v49 = vmax.f32 %v2276_v30, 0.0 }
 0x544   : > { %v2596_v46 = vmax.f32 %v2215_v34, 0.0  ;;  %v2598_v41 = vmax.f32 %v2278_v26, 0.0  ;;  %4920 = vmatprep.subr.bf16.mxu1 %v5298_v28  ;;  %4954 = vmatprep.subr.bf16.mxu0 %v5299_v29  ;;  %v6205_v12 = vrot.slane %v6194_v51, %v1793_v57  ;;  %v6219_v30 = vrot.slane %v6194_v51, %v1797_v60  ;;  %v5310_v60 = vld [vmem:[%s5609_s18 + $0x260] sm:$0xff]  }
 0x545   : > { %v2597_v19 = vmax.f32 %v2217_v36, 0.0  ;;  %v2599_v50 = vmax.f32 %v2280_v37, 0.0 }
 0x546   : > { %v2660_v52 = vpack.c.bf16 %v2596_v46, %v2580_v39  ;;  %v2662_v53 = vpack.c.bf16 %v2598_v41, %v2582_v40 }
 0x547   : > { %v2661_v54 = vpack.c.bf16 %v2597_v19, %v2581_v48  ;;  %v2663_v5 = vpack.c.bf16 %v2599_v50, %v2583_v49  ;;  %4921 = vmatpush3.bf16.msra.mxu1 %v5300_v38  ;;  %4955 = vmatpush3.bf16.msra.mxu0 %v5301_v32  ;;  %v2220_v6 = vpop.f32.mrb[56].mxu1  ;;  %v2283_v8 = vpop.f32.mrb[56].mxu0 }
 0x548   : > { %v2221_v2 = vadd.f32 %v2220_v6, %v6136_v15  ;;  %v2284_v63 = vadd.f32 %v2283_v8, %v6145_v55  ;;  %v2222_v14 = vpop.f32.mrb[57].mxu1  ;;  %v2285_v17 = vpop.f32.mrb[57].mxu0  ;;  %4922 = vmatprep.subr.bf16.mxu1 %v5302_v43  ;;  %4956 = vmatprep.subr.bf16.mxu0 %v5303_v44  ;;  %v5312_v43 = vld [vmem:[%s5609_s18 + $0x220] sm:$0xff]  }
 0x549   : > { %v2223_v0 = vadd.f32 %v2222_v14, %v6152_v10  ;;  %v2286_v24 = vadd.f32 %v2285_v17, %v6159_v62  ;;  %v2224_v1 = vpop.f32.mrb[58].mxu1  ;;  %v2287_v16 = vpop.f32.mrb[58].mxu0  ;;  %3873 = vmatprep.mubr.bf16.mxu1 %v2661_v54  ;;  %3930 = vmatprep.mubr.bf16.mxu0 %v2663_v5  ;;  %v5313_v44 = vld [vmem:[%s5609_s18 + $0x2a0] sm:$0xff]  }
 0x54a   : > { %v2225_v28 = vadd.f32 %v2224_v1, %v6136_v15  ;;  %v2288_v57 = vadd.f32 %v2287_v16, %v6145_v55  ;;  %v2226_v29 = vpop.f32.mrb[59].mxu1  ;;  %v2289_v59 = vpop.f32.mrb[59].mxu0  ;;  %3874 = vmatmul.mubr.bf16.gmra.mrb[100].mxu1 %v2660_v52  ;;  %3931 = vmatmul.mubr.bf16.gmra.mrb[100].mxu0 %v2662_v53  ;;  %v5308_v15 = vld [vmem:[%s5609_s18 + $0x218] sm:$0xff]   ;;  %v6228_v55 = vrot.slane %v6194_v51, %v1805_v61  ;;  %v2612_v34 = vmax.f32 %v2221_v2, 0.0  ;;  %v5314_v52 = vld [vmem:[%s5609_s18 + $0x268] sm:$0xff]  }
 0x54b   : > { %v2227_v31 = vadd.f32 %v2226_v29, %v6152_v10  ;;  %v2290_v58 = vadd.f32 %v2289_v59, %v6159_v62  ;;  %4923 = vmatpush3.bf16.msra.mxu1 %v5304_v4  ;;  %4957 = vmatpush3.bf16.msra.mxu0 %v5305_v11  ;;  %v2614_v26 = vmax.f32 %v2284_v63, 0.0  ;;  %v5311_v10 = vld [vmem:[%s5609_s18 + $0x2e0] sm:$0xff]   ;;  %v2613_v62 = vmax.f32 %v2223_v0, 0.0  ;;  %v5315_v53 = vld [vmem:[%s5609_s18 + $0x2e8] sm:$0xff]  }
 0x54c   : > { %v2628_v20 = vmax.f32 %v2225_v28, 0.0  ;;  %v2630_v35 = vmax.f32 %v2288_v57, 0.0  ;;  %4924 = vmatprep.subr.bf16.mxu1 %v5306_v18  ;;  %4958 = vmatprep.subr.bf16.mxu0 %v5307_v13  ;;  %v2615_v36 = vmax.f32 %v2286_v24, 0.0  ;;  %v5316_v18 = vld [vmem:[%s5609_s18 + $0x228] sm:$0xff]   ;;  %v5318_v28 = vld [vmem:[%s5609_s18 + $0x270] sm:$0xff]  }
 0x54d   : > { %v2629_v37 = vmax.f32 %v2227_v31, 0.0  ;;  %v2631_v38 = vmax.f32 %v2290_v58, 0.0  ;;  %v5317_v13 = vld [vmem:[%s5609_s18 + $0x2a8] sm:$0xff]   ;;  %v5319_v57 = vld [vmem:[%s5609_s18 + $0x2f0] sm:$0xff]  }
 0x54e   : > { %v2676_v32 = vpack.c.bf16 %v2628_v20, %v2612_v34  ;;  %v2678_v39 = vpack.c.bf16 %v2630_v35, %v2614_v26 }
 0x54f   : > { %v2677_v61 = vpack.c.bf16 %v2629_v37, %v2613_v62  ;;  %v2679_v40 = vpack.c.bf16 %v2631_v38, %v2615_v36  ;;  %4925 = vmatpush3.bf16.msra.mxu1 %v5308_v15  ;;  %4959 = vmatpush3.bf16.msra.mxu0 %v5309_v33  ;;  %v2326_v46 = vpop.f32.mrb[60].mxu1  ;;  %v2389_v41 = vpop.f32.mrb[60].mxu0 }
 0x550   : > { %v2327_v48 = vadd.f32 %v2326_v46, %v6205_v12  ;;  %v2390_v49 = vadd.f32 %v2389_v41, %v6212_v21  ;;  %v2328_v19 = vpop.f32.mrb[61].mxu1  ;;  %v2391_v50 = vpop.f32.mrb[61].mxu0  ;;  %4926 = vmatprep.subr.bf16.mxu1 %v5310_v60  ;;  %4960 = vmatprep.subr.bf16.mxu0 %v5311_v10  ;;  %v5320_v60 = vld [vmem:[%s5609_s18 + $0x230] sm:$0xff]  }
 0x551   : > { %v2329_v54 = vadd.f32 %v2328_v19, %v6219_v30  ;;  %v2392_v5 = vadd.f32 %v2391_v50, %v6228_v55  ;;  %v2330_v6 = vpop.f32.mrb[62].mxu1  ;;  %v2393_v8 = vpop.f32.mrb[62].mxu0  ;;  %3881 = vmatprep.mubr.bf16.mxu1 %v2677_v61  ;;  %3938 = vmatprep.mubr.bf16.mxu0 %v2679_v40  ;;  %v5321_v10 = vld [vmem:[%s5609_s18 + $0x2b0] sm:$0xff]  }
 0x552   : > { %v2331_v4 = vadd.f32 %v2330_v6, %v6205_v12  ;;  %v2394_v11 = vadd.f32 %v2393_v8, %v6212_v21  ;;  %v2332_v2 = vpop.f32.mrb[63].mxu1  ;;  %v2395_v63 = vpop.f32.mrb[63].mxu0  ;;  %3882 = vmatmul.mubr.bf16.gmra.mrb[104].mxu1 %v2676_v32  ;;  %3939 = vmatmul.mubr.bf16.gmra.mrb[104].mxu0 %v2678_v39  ;;  %v2552_v0 = vmax.f32 %v2327_v48, 0.0  ;;  %v2554_v24 = vmax.f32 %v2390_v49, 0.0  ;;  %v5322_v32 = vld [vmem:[%s5609_s18 + $0x278] sm:$0xff]  }
 0x553   : > { %v2333_v14 = vadd.f32 %v2332_v2, %v6219_v30  ;;  %v2396_v17 = vadd.f32 %v2395_v63, %v6228_v55  ;;  %4927 = vmatpush3.bf16.msra.mxu1 %v5312_v43  ;;  %4961 = vmatpush3.bf16.msra.mxu0 %v5313_v44  ;;  %v2553_v29 = vmax.f32 %v2329_v54, 0.0  ;;  %v2555_v59 = vmax.f32 %v2392_v5, 0.0  ;;  %v5323_v39 = vld [vmem:[%s5609_s18 + $0x2f8] sm:$0xff]  }
 0x554   : > { %v2568_v1 = vmax.f32 %v2331_v4, 0.0  ;;  %v2570_v16 = vmax.f32 %v2394_v11, 0.0  ;;  %4928 = vmatprep.subr.bf16.mxu1 %v5314_v52  ;;  %4962 = vmatprep.subr.bf16.mxu0 %v5315_v53  ;;  %v5324_v52 = vld [vmem:[%s5609_s18 + $0x238] sm:$0xff]   ;;  %v5326_v4 = vld [vmem:[%s5609_s18 + $0x340] sm:$0xff]  }
 0x555   : > { %v2569_v31 = vmax.f32 %v2333_v14, 0.0  ;;  %v2571_v58 = vmax.f32 %v2396_v17, 0.0  ;;  %v5325_v53 = vld [vmem:[%s5609_s18 + $0x2b8] sm:$0xff]   ;;  %v5327_v11 = vld [vmem:[%s5609_s18 + $0x3c0] sm:$0xff]  }
 0x556   : > { %v6248_v15 = vpack.c.bf16 %v2568_v1, %v2552_v0  ;;  %v6250_v33 = vpack.c.bf16 %v2570_v16, %v2554_v24 }
 0x557   : > { %v2649_v34 = vpack.c.bf16 %v2569_v31, %v2553_v29  ;;  %v2651_v26 = vpack.c.bf16 %v2571_v58, %v2555_v59  ;;  %4929 = vmatpush3.bf16.msra.mxu1 %v5316_v18  ;;  %4963 = vmatpush3.bf16.msra.mxu0 %v5317_v13  ;;  %v2336_v20 = vpop.f32.mrb[64].mxu1  ;;  %v2399_v35 = vpop.f32.mrb[64].mxu0  ;;  %v5328_v31 = vld [vmem:[%s5609_s18 + $0x300] sm:$0xff]  }
 0x558   : > { %v2337_v62 = vadd.f32 %v2336_v20, %v6205_v12  ;;  %v2400_v36 = vadd.f32 %v2399_v35, %v6212_v21  ;;  %v2338_v37 = vpop.f32.mrb[65].mxu1  ;;  %v2401_v38 = vpop.f32.mrb[65].mxu0  ;;  %4930 = vmatprep.subr.bf16.mxu1 %v5318_v28  ;;  %4964 = vmatprep.subr.bf16.mxu0 %v5319_v57  ;;  %v5329_v58 = vld [vmem:[%s5609_s18 + $0x380] sm:$0xff]  }
 0x559   : > { %v2339_v61 = vadd.f32 %v2338_v37, %v6219_v30  ;;  %v2402_v40 = vadd.f32 %v2401_v38, %v6228_v55  ;;  %v2340_v46 = vpop.f32.mrb[66].mxu1  ;;  %v2403_v41 = vpop.f32.mrb[66].mxu0  ;;  %3979 = vmatprep.mubr.bf16.mxu1 %v2649_v34  ;;  %4036 = vmatprep.mubr.bf16.mxu0 %v2651_v26 }
 0x55a   : > { %v2341_v43 = vadd.f32 %v2340_v46, %v6205_v12  ;;  %v2404_v44 = vadd.f32 %v2403_v41, %v6212_v21  ;;  %v2342_v48 = vpop.f32.mrb[67].mxu1  ;;  %v2405_v49 = vpop.f32.mrb[67].mxu0  ;;  %v2584_v54 = vmax.f32 %v2337_v62, 0.0  ;;  %v2586_v5 = vmax.f32 %v2400_v36, 0.0  ;;  %v5333_v46 = vld [vmem:[%s5609_s18 + $0x388] sm:$0xff]  }
 0x55b   : > { %v2343_v19 = vadd.f32 %v2342_v48, %v6219_v30  ;;  %v2406_v50 = vadd.f32 %v2405_v49, %v6228_v55  ;;  %4931 = vmatpush3.bf16.msra.mxu1 %v5320_v60  ;;  %4965 = vmatpush3.bf16.msra.mxu0 %v5321_v10  ;;  %v2585_v2 = vmax.f32 %v2339_v61, 0.0  ;;  %v2587_v63 = vmax.f32 %v2402_v40, 0.0  ;;  %v5330_v60 = vld [vmem:[%s5609_s18 + $0x348] sm:$0xff]  }
 0x55c   : > { %v2600_v6 = vmax.f32 %v2341_v43, 0.0  ;;  %v2602_v8 = vmax.f32 %v2404_v44, 0.0  ;;  %4932 = vmatprep.subr.bf16.mxu1 %v5322_v32  ;;  %4966 = vmatprep.subr.bf16.mxu0 %v5323_v39  ;;  %v5331_v10 = vld [vmem:[%s5609_s18 + $0x3c8] sm:$0xff]   ;;  %v6283_v62 = vrot.slane %v6194_v51, %v1809_v25  ;;  %v6288_v36 = vrot.slane %v6194_v51, %v1817_v23 }
 0x55d   : > { %v2601_v14 = vmax.f32 %v2343_v19, 0.0  ;;  %v2603_v17 = vmax.f32 %v2406_v50, 0.0  ;;  %v6297_v25 = vrot.slane %v6194_v51, %v1813_v7  ;;  %v5332_v7 = vld [vmem:[%s5609_s18 + $0x308] sm:$0xff]  }
 0x55e   : > { %v6268_v18 = vpack.c.bf16 %v2600_v6, %v2584_v54  ;;  %v6270_v13 = vpack.c.bf16 %v2602_v8, %v2586_v5  ;;  %v5336_v6 = vld [vmem:[%s5609_s18 + $0x310] sm:$0xff]  }
 0x55f   : > { %v2665_v0 = vpack.c.bf16 %v2601_v14, %v2585_v2  ;;  %v2667_v24 = vpack.c.bf16 %v2603_v17, %v2587_v63  ;;  %4933 = vmatpush3.bf16.msra.mxu1 %v5324_v52  ;;  %4967 = vmatpush3.bf16.msra.mxu0 %v5325_v53  ;;  %v2346_v1 = vpop.f32.mrb[68].mxu1  ;;  %v2409_v16 = vpop.f32.mrb[68].mxu0  ;;  %v5337_v8 = vld [vmem:[%s5609_s18 + $0x390] sm:$0xff]   ;;  %v5338_v14 = vld [vmem:[%s5609_s18 + $0x358] sm:$0xff]  }
 0x560   : > { %v2347_v28 = vadd.f32 %v2346_v1, %v6205_v12  ;;  %v2410_v57 = vadd.f32 %v2409_v16, %v6212_v21  ;;  %v2348_v29 = vpop.f32.mrb[69].mxu1  ;;  %v2411_v59 = vpop.f32.mrb[69].mxu0  ;;  %4986 = vmatprep.subr.bf16.mxu1 %v5326_v4  ;;  %5020 = vmatprep.subr.bf16.mxu0 %v5327_v11  ;;  %v5339_v17 = vld [vmem:[%s5609_s18 + $0x3d8] sm:$0xff]  }
 0x561   : > { %v2349_v34 = vadd.f32 %v2348_v29, %v6219_v30  ;;  %v2412_v26 = vadd.f32 %v2411_v59, %v6228_v55  ;;  %v2350_v20 = vpop.f32.mrb[70].mxu1  ;;  %v2413_v35 = vpop.f32.mrb[70].mxu0 }
 0x562   : > { %v2351_v37 = vadd.f32 %v2350_v20, %v6205_v12  ;;  %v2414_v38 = vadd.f32 %v2413_v35, %v6212_v21  ;;  %3980 = vmatmul.mubr.bf16.vlgmr.msra.gmra.mrb[108].mxu1 %v6248_v15  ;;  %4037 = vmatmul.mubr.bf16.vlgmr.msra.gmra.mrb[108].mxu0 %v6250_v33  ;;  %v2352_v32 = vpop.f32.mrb[71].mxu1  ;;  %v2415_v39 = vpop.f32.mrb[71].mxu0  ;;  %v6304_v12 = vrot.slane %v6194_v51, %v1821_v42  ;;  %v2616_v21 = vmax.f32 %v2347_v28, 0.0  ;;  %v5335_v42 = vld [vmem:[%s5609_s18 + $0x3d0] sm:$0xff]  }
 0x563   : > { %v2353_v23 = vadd.f32 %v2352_v32, %v6219_v30  ;;  %v2416_v61 = vadd.f32 %v2415_v39, %v6228_v55  ;;  %3987 = vmatprep.mubr.bf16.mxu1 %v2665_v0  ;;  %4044 = vmatprep.mubr.bf16.mxu0 %v2667_v24  ;;  %v2618_v15 = vmax.f32 %v2410_v57, 0.0  ;;  %v2617_v30 = vmax.f32 %v2349_v34, 0.0  ;;  %v5340_v34 = vld [vmem:[%s5609_s18 + $0x318] sm:$0xff]  }
 0x564   : > { %v2632_v33 = vmax.f32 %v2351_v37, 0.0  ;;  %v2634_v40 = vmax.f32 %v2414_v38, 0.0  ;;  %4987 = vmatpush3.bf16.msra.mxu1 %v5328_v31  ;;  %5021 = vmatpush3.bf16.msra.mxu0 %v5329_v58  ;;  %v2619_v41 = vmax.f32 %v2412_v26, 0.0 }
 0x565   : > { %v2633_v55 = vmax.f32 %v2353_v23, 0.0  ;;  %v2635_v43 = vmax.f32 %v2416_v61, 0.0  ;;  %4988 = vmatprep.subr.bf16.mxu1 %v5330_v60  ;;  %5022 = vmatprep.subr.bf16.mxu0 %v5331_v10  ;;  %v5342_v60 = vld [vmem:[%s5609_s18 + $0x360] sm:$0xff]  }
 0x566   : > { %v6310_v51 = vpack.c.bf16 %v2632_v33, %v2616_v21  ;;  %v6312_v44 = vpack.c.bf16 %v2634_v40, %v2618_v15  ;;  %v5343_v10 = vld [vmem:[%s5609_s18 + $0x3e0] sm:$0xff]  }
 0x567   : > { %v2681_v48 = vpack.c.bf16 %v2633_v55, %v2617_v30  ;;  %v2683_v49 = vpack.c.bf16 %v2635_v43, %v2619_v41  ;;  %v2452_v19 = vpop.f32.mrb[72].mxu1  ;;  %v2515_v50 = vpop.f32.mrb[72].mxu0 }
 0x568   : > { %4989 = vmatpush3.bf16.msra.mxu1 %v5332_v7  ;;  %5023 = vmatpush3.bf16.msra.mxu0 %v5333_v46  ;;  %v2453_v52 = vadd.f32 %v2452_v19, %v6283_v62  ;;  %v2516_v53 = vadd.f32 %v2515_v50, %v6288_v36  ;;  %v2454_v54 = vpop.f32.mrb[73].mxu1  ;;  %v2517_v5 = vpop.f32.mrb[73].mxu0  ;;  %v5344_v7 = vld [vmem:[%s5609_s18 + $0x320] sm:$0xff]  }
 0x569   : > { %v2455_v4 = vadd.f32 %v2454_v54, %v6297_v25  ;;  %v2518_v11 = vadd.f32 %v2517_v5, %v6304_v12  ;;  %v2456_v2 = vpop.f32.mrb[74].mxu1  ;;  %v2519_v63 = vpop.f32.mrb[74].mxu0  ;;  %4990 = vmatprep.subr.bf16.mxu1 %v5334_v56  ;;  %5024 = vmatprep.subr.bf16.mxu0 %v5335_v42  ;;  %v5345_v46 = vld [vmem:[%s5609_s18 + $0x3a0] sm:$0xff]   ;;  %v5346_v56 = vld [vmem:[%s5609_s18 + $0x368] sm:$0xff]  }
 0x56a   : > { %v2457_v0 = vadd.f32 %v2456_v2, %v6283_v62  ;;  %v2520_v24 = vadd.f32 %v2519_v63, %v6288_v36  ;;  %3988 = vmatmul.mubr.bf16.gmra.mrb[112].mxu1 %v6268_v18  ;;  %4045 = vmatmul.mubr.bf16.gmra.mrb[112].mxu0 %v6270_v13  ;;  %v2458_v1 = vpop.f32.mrb[75].mxu1  ;;  %v2521_v16 = vpop.f32.mrb[75].mxu0  ;;  %v2556_v29 = vmax.f32 %v2453_v52, 0.0  ;;  %v2558_v59 = vmax.f32 %v2516_v53, 0.0  ;;  %v5341_v18 = vld [vmem:[%s5609_s18 + $0x398] sm:$0xff]   ;;  %v5347_v42 = vld [vmem:[%s5609_s18 + $0x3e8] sm:$0xff]  }
 0x56b   : > { %v2459_v28 = vadd.f32 %v2458_v1, %v6297_v25  ;;  %v2522_v57 = vadd.f32 %v2521_v16, %v6304_v12  ;;  %3995 = vmatprep.mubr.bf16.mxu1 %v2681_v48  ;;  %4052 = vmatprep.mubr.bf16.mxu0 %v2683_v49  ;;  %v2557_v26 = vmax.f32 %v2455_v4, 0.0  ;;  %v2559_v13 = vmax.f32 %v2518_v11, 0.0  ;;  %v5348_v4 = vld [vmem:[%s5609_s18 + $0x328] sm:$0xff]  }
 0x56c   : > { %v2572_v31 = vmax.f32 %v2457_v0, 0.0  ;;  %v2574_v58 = vmax.f32 %v2520_v24, 0.0  ;;  %4991 = vmatpush3.bf16.msra.mxu1 %v5336_v6  ;;  %5025 = vmatpush3.bf16.msra.mxu0 %v5337_v8 }
 0x56d   : > { %v2573_v20 = vmax.f32 %v2459_v28, 0.0  ;;  %v2575_v35 = vmax.f32 %v2522_v57, 0.0  ;;  %4992 = vmatprep.subr.bf16.mxu1 %v5338_v14  ;;  %5026 = vmatprep.subr.bf16.mxu0 %v5339_v17  ;;  %v5350_v14 = vld [vmem:[%s5609_s18 + $0x370] sm:$0xff]  }
 0x56e   : > { %v6332_v37 = vpack.c.bf16 %v2572_v31, %v2556_v29  ;;  %v6334_v38 = vpack.c.bf16 %v2574_v58, %v2558_v59  ;;  %v5351_v17 = vld [vmem:[%s5609_s18 + $0x3f0] sm:$0xff]  }
 0x56f   : > { %v2653_v32 = vpack.c.bf16 %v2573_v20, %v2557_v26  ;;  %v2655_v39 = vpack.c.bf16 %v2575_v35, %v2559_v13  ;;  %v2462_v23 = vpop.f32.mrb[76].mxu1  ;;  %v2525_v61 = vpop.f32.mrb[76].mxu0 }
 0x570   : > { %4993 = vmatpush3.bf16.msra.mxu1 %v5340_v34  ;;  %5027 = vmatpush3.bf16.msra.mxu0 %v5341_v18  ;;  %v2463_v21 = vadd.f32 %v2462_v23, %v6283_v62  ;;  %v2526_v15 = vadd.f32 %v2525_v61, %v6288_v36  ;;  %v2464_v33 = vpop.f32.mrb[77].mxu1  ;;  %v2527_v40 = vpop.f32.mrb[77].mxu0  ;;  %v5352_v34 = vld [vmem:[%s5609_s18 + $0x330] sm:$0xff]  }
 0x571   : > { %v2465_v30 = vadd.f32 %v2464_v33, %v6297_v25  ;;  %v2528_v41 = vadd.f32 %v2527_v40, %v6304_v12  ;;  %v2466_v55 = vpop.f32.mrb[78].mxu1  ;;  %v2529_v43 = vpop.f32.mrb[78].mxu0  ;;  %4994 = vmatprep.subr.bf16.mxu1 %v5342_v60  ;;  %5028 = vmatprep.subr.bf16.mxu0 %v5343_v10  ;;  %v5353_v18 = vld [vmem:[%s5609_s18 + $0x3b0] sm:$0xff]   ;;  %v5354_v60 = vld [vmem:[%s5609_s18 + $0x378] sm:$0xff]  }
 0x572   : > { %v2467_v48 = vadd.f32 %v2466_v55, %v6283_v62  ;;  %v2530_v49 = vadd.f32 %v2529_v43, %v6288_v36  ;;  %3996 = vmatmul.mubr.bf16.gmra.mrb[116].mxu1 %v6310_v51  ;;  %4053 = vmatmul.mubr.bf16.gmra.mrb[116].mxu0 %v6312_v44  ;;  %v2468_v19 = vpop.f32.mrb[79].mxu1  ;;  %v2531_v50 = vpop.f32.mrb[79].mxu0  ;;  %v2588_v54 = vmax.f32 %v2463_v21, 0.0  ;;  %v2590_v5 = vmax.f32 %v2526_v15, 0.0  ;;  %v5349_v51 = vld [vmem:[%s5609_s18 + $0x3a8] sm:$0xff]   ;;  %v5355_v10 = vld [vmem:[%s5609_s18 + $0x3f8] sm:$0xff]  }
 0x573   : > { %v2469_v52 = vadd.f32 %v2468_v19, %v6297_v25  ;;  %v2532_v53 = vadd.f32 %v2531_v50, %v6304_v12  ;;  %4093 = vmatprep.mubr.bf16.mxu1 %v2653_v32  ;;  %4150 = vmatprep.mubr.bf16.mxu0 %v2655_v39  ;;  %v2589_v11 = vmax.f32 %v2465_v30, 0.0  ;;  %v2591_v44 = vmax.f32 %v2528_v41, 0.0  ;;  %v5356_v30 = vld [vmem:[%s5609_s18 + $0x338] sm:$0xff]   ;;  %v4594_v19 = vld [vmem:[%s797_s27] ss:$0 sm:$0xff] }
 0x574   : > { %v2604_v6 = vmax.f32 %v2467_v48, 0.0  ;;  %v2606_v8 = vmax.f32 %v2530_v49, 0.0  ;;  %4995 = vmatpush3.bf16.msra.mxu1 %v5344_v7  ;;  %5029 = vmatpush3.bf16.msra.mxu0 %v5345_v46  ;;  %v5357_v41 = vld [vmem:[%s5609_s18 + $0x3b8] sm:$0xff]  }
 0x575   : > { %v2605_v2 = vmax.f32 %v2469_v52, 0.0  ;;  %v2607_v63 = vmax.f32 %v2532_v53, 0.0  ;;  %4996 = vmatprep.subr.bf16.mxu1 %v5346_v56  ;;  %5030 = vmatprep.subr.bf16.mxu0 %v5347_v42 }
 0x576   : > { %v2668_v0 = vpack.c.bf16 %v2604_v6, %v2588_v54  ;;  %v2670_v24 = vpack.c.bf16 %v2606_v8, %v2590_v5 }
 0x577   : > { %v2669_v1 = vpack.c.bf16 %v2605_v2, %v2589_v11  ;;  %v2671_v16 = vpack.c.bf16 %v2607_v63, %v2591_v44  ;;  %v2472_v28 = vpop.f32.mrb[80].mxu1  ;;  %v2535_v57 = vpop.f32.mrb[80].mxu0 }
 0x578   : > { %4997 = vmatpush3.bf16.msra.mxu1 %v5348_v4  ;;  %5031 = vmatpush3.bf16.msra.mxu0 %v5349_v51  ;;  %v2473_v29 = vadd.f32 %v2472_v28, %v6283_v62  ;;  %v2536_v59 = vadd.f32 %v2535_v57, %v6288_v36  ;;  %v2474_v31 = vpop.f32.mrb[81].mxu1  ;;  %v2537_v58 = vpop.f32.mrb[81].mxu0 }
 0x579   : > { %v2475_v26 = vadd.f32 %v2474_v31, %v6297_v25  ;;  %v2538_v13 = vadd.f32 %v2537_v58, %v6304_v12  ;;  %v2476_v20 = vpop.f32.mrb[82].mxu1  ;;  %v2539_v35 = vpop.f32.mrb[82].mxu0  ;;  %4998 = vmatprep.subr.bf16.mxu1 %v5350_v14  ;;  %5032 = vmatprep.subr.bf16.mxu0 %v5351_v17 }
 0x57a   : > { %v2477_v32 = vadd.f32 %v2476_v20, %v6283_v62  ;;  %v2540_v39 = vadd.f32 %v2539_v35, %v6288_v36  ;;  %v2478_v23 = vpop.f32.mrb[83].mxu1  ;;  %v2541_v61 = vpop.f32.mrb[83].mxu0  ;;  %v2620_v33 = vmax.f32 %v2473_v29, 0.0  ;;  %v2622_v40 = vmax.f32 %v2536_v59, 0.0 }
 0x57b   : > { %v2479_v21 = vadd.f32 %v2478_v23, %v6297_v25  ;;  %v2542_v15 = vadd.f32 %v2541_v61, %v6304_v12  ;;  %v2621_v55 = vmax.f32 %v2475_v26, 0.0  ;;  %v2623_v43 = vmax.f32 %v2538_v13, 0.0 }
 0x57c   : > { %v2636_v7 = vmax.f32 %v2477_v32, 0.0  ;;  %v2638_v46 = vmax.f32 %v2540_v39, 0.0  ;;  %4999 = vmatpush3.bf16.msra.mxu1 %v5352_v34  ;;  %5033 = vmatpush3.bf16.msra.mxu0 %v5353_v18 }
 0x57d   : > { %v2637_v56 = vmax.f32 %v2479_v21, 0.0  ;;  %v2639_v62 = vmax.f32 %v2542_v15, 0.0  ;;  %5000 = vmatprep.subr.bf16.mxu1 %v5354_v60  ;;  %5034 = vmatprep.subr.bf16.mxu0 %v5355_v10 }
 0x57e   : > { %v2684_v36 = vpack.c.bf16 %v2636_v7, %v2620_v33  ;;  %v2686_v42 = vpack.c.bf16 %v2638_v46, %v2622_v40 }
 0x57f   : > { %v2685_v48 = vpack.c.bf16 %v2637_v56, %v2621_v55  ;;  %v2687_v25 = vpack.c.bf16 %v2639_v62, %v2623_v43 }
 0x580   : > { %5001 = vmatpush3.bf16.msra.mxu1 %v5356_v30  ;;  %5035 = vmatpush3.bf16.msra.mxu0 %v5357_v41 }
 0x583   : > { %4094 = vmatmul.mubr.bf16.vlgmr.msra.gmra.mrb[120].mxu1 %v6332_v37  ;;  %4151 = vmatmul.mubr.bf16.vlgmr.msra.gmra.mrb[120].mxu0 %v6334_v38 }
 0x584   : > { %4101 = vmatprep.mubr.bf16.mxu1 %v2669_v1  ;;  %4158 = vmatprep.mubr.bf16.mxu0 %v2671_v16 }
 0x58b   : > { %4102 = vmatmul.mubr.bf16.gmra.mrb[124].mxu1 %v2668_v0  ;;  %4159 = vmatmul.mubr.bf16.gmra.mrb[124].mxu0 %v2670_v24 }
 0x58c   : > { %4109 = vmatprep.mubr.bf16.mxu1 %v2685_v48  ;;  %4166 = vmatprep.mubr.bf16.mxu0 %v2687_v25 }
 0x593   : > { %4110 = vmatmul.mubr.bf16.gmra.mrb[128].mxu1 %v2684_v36  ;;  %4167 = vmatmul.mubr.bf16.gmra.mrb[128].mxu0 %v2686_v42 }
 0x5f1   : > { %v4798_v12 = vpop.f32.mrb[84].mxu1  ;;  %v4832_v49 = vpop.f32.mrb[84].mxu0 }
 0x5f2   : > { %v4799_v50 = vpop.f32.mrb[85].mxu1  ;;  %v4833_v52 = vpop.f32.mrb[85].mxu0 }
 0x5f3   : > { %v4800_v37 = vadd.f32 %v4799_v50, %v4798_v12  ;;  %v4834_v53 = vadd.f32 %v4833_v52, %v4832_v49  ;;  %v4801_v38 = vpop.f32.mrb[86].mxu1  ;;  %v4835_v54 = vpop.f32.mrb[86].mxu0 }
 0x5f4   : > { %v4802_v5 = vpop.f32.mrb[87].mxu1  ;;  %v4836_v6 = vpop.f32.mrb[87].mxu0 }
 0x5f5   : > { %v3754_v8 = vadd.f32 %v4800_v37, %v4594_v19  ;;  %v4803_v4 = vadd.f32 %v4802_v5, %v4801_v38  ;;  %v4837_v51 = vadd.f32 %v4836_v6, %v4835_v54 }
 0x5f7   : > { %v3811_v11 = vadd.f32 %v4834_v53, %v3754_v8  ;;  %v3757_v44 = vadd.f32 %v4803_v4, %v4594_v19 }
 0x5f9   : > { %v3814_v2 = vadd.f32 %v4837_v51, %v3757_v44 }
 0x605   : > { %v4804_v63 = vpop.f32.mrb[88].mxu1  ;;  %v4838_v14 = vpop.f32.mrb[88].mxu0 }
 0x606   : > { %v4805_v17 = vpop.f32.mrb[89].mxu1  ;;  %v4839_v0 = vpop.f32.mrb[89].mxu0 }
 0x607   : > { %v4806_v24 = vadd.f32 %v4805_v17, %v4804_v63  ;;  %v4840_v1 = vadd.f32 %v4839_v0, %v4838_v14  ;;  %v4807_v16 = vpop.f32.mrb[90].mxu1  ;;  %v4841_v28 = vpop.f32.mrb[90].mxu0 }
 0x608   : > { %v4808_v57 = vpop.f32.mrb[91].mxu1  ;;  %v4842_v29 = vpop.f32.mrb[91].mxu0 }
 0x609   : > { %v3762_v59 = vadd.f32 %v4806_v24, %v4594_v19  ;;  %v4809_v31 = vadd.f32 %v4808_v57, %v4807_v16  ;;  %v4843_v58 = vadd.f32 %v4842_v29, %v4841_v28 }
 0x60b   : > { %v3819_v34 = vadd.f32 %v4840_v1, %v3762_v59  ;;  %v3765_v18 = vadd.f32 %v4809_v31, %v4594_v19 }
 0x60d   : > { %v3822_v26 = vadd.f32 %v4843_v58, %v3765_v18  ;;  %v4810_v13 = vpop.f32.mrb[92].mxu1  ;;  %v4844_v20 = vpop.f32.mrb[92].mxu0 }
 0x60e   : > { %v4811_v35 = vpop.f32.mrb[93].mxu1  ;;  %v4845_v60 = vpop.f32.mrb[93].mxu0 }
 0x60f   : > { %v4812_v10 = vadd.f32 %v4811_v35, %v4810_v13  ;;  %v4846_v32 = vadd.f32 %v4845_v60, %v4844_v20  ;;  %v4813_v39 = vpop.f32.mrb[94].mxu1  ;;  %v4847_v23 = vpop.f32.mrb[94].mxu0 }
 0x610   : > { %v4814_v61 = vpop.f32.mrb[95].mxu1  ;;  %v4848_v21 = vpop.f32.mrb[95].mxu0 }
 0x611   : > { %v3770_v15 = vadd.f32 %v4812_v10, %v4594_v19  ;;  %v4815_v33 = vadd.f32 %v4814_v61, %v4813_v39  ;;  %v4849_v40 = vadd.f32 %v4848_v21, %v4847_v23 }
 0x613   : > { %v3827_v7 = vadd.f32 %v4846_v32, %v3770_v15  ;;  %v3773_v46 = vadd.f32 %v4815_v33, %v4594_v19 }
 0x615   : > { %v3830_v30 = vadd.f32 %v4849_v40, %v3773_v46  ;;  %v4866_v41 = vpop.f32.mrb[96].mxu1  ;;  %v4900_v55 = vpop.f32.mrb[96].mxu0 }
 0x616   : > { %v4867_v43 = vpop.f32.mrb[97].mxu1  ;;  %v4901_v56 = vpop.f32.mrb[97].mxu0 }
 0x617   : > { %v4868_v62 = vadd.f32 %v4867_v43, %v4866_v41  ;;  %v4902_v36 = vadd.f32 %v4901_v56, %v4900_v55  ;;  %v4869_v42 = vpop.f32.mrb[98].mxu1  ;;  %v4903_v48 = vpop.f32.mrb[98].mxu0 }
 0x618   : > { %v4870_v25 = vpop.f32.mrb[99].mxu1  ;;  %v4904_v12 = vpop.f32.mrb[99].mxu0 }
 0x619   : > { %v3868_v49 = vadd.f32 %v4868_v62, %v3811_v11  ;;  %v4871_v50 = vadd.f32 %v4870_v25, %v4869_v42  ;;  %v4905_v52 = vadd.f32 %v4904_v12, %v4903_v48 }
 0x61b   : > { %v3925_v37 = vadd.f32 %v4902_v36, %v3868_v49  ;;  %v3871_v53 = vadd.f32 %v4871_v50, %v3814_v2 }
 0x61d   : > { %v3928_v38 = vadd.f32 %v4905_v52, %v3871_v53  ;;  %v4872_v54 = vpop.f32.mrb[100].mxu1  ;;  %v4906_v5 = vpop.f32.mrb[100].mxu0 }
 0x61e   : > { %v4873_v19 = vpop.f32.mrb[101].mxu1  ;;  %v4907_v6 = vpop.f32.mrb[101].mxu0 }
 0x61f   : > { %v4874_v8 = vadd.f32 %v4873_v19, %v4872_v54  ;;  %v4908_v4 = vadd.f32 %v4907_v6, %v4906_v5  ;;  %v4875_v51 = vpop.f32.mrb[102].mxu1  ;;  %v4909_v44 = vpop.f32.mrb[102].mxu0 }
 0x620   : > { %v4876_v63 = vpop.f32.mrb[103].mxu1  ;;  %v4910_v14 = vpop.f32.mrb[103].mxu0 }
 0x621   : > { %v3876_v17 = vadd.f32 %v4874_v8, %v3819_v34  ;;  %v4877_v0 = vadd.f32 %v4876_v63, %v4875_v51  ;;  %v4911_v24 = vadd.f32 %v4910_v14, %v4909_v44 }
 0x623   : > { %v3933_v1 = vadd.f32 %v4908_v4, %v3876_v17  ;;  %v3879_v11 = vadd.f32 %v4877_v0, %v3822_v26 }
 0x625   : > { %v3936_v16 = vadd.f32 %v4911_v24, %v3879_v11  ;;  %v4878_v28 = vpop.f32.mrb[104].mxu1  ;;  %v4912_v57 = vpop.f32.mrb[104].mxu0 }
 0x626   : > { %v4879_v2 = vpop.f32.mrb[105].mxu1  ;;  %v4913_v29 = vpop.f32.mrb[105].mxu0 }
 0x627   : > { %v4880_v59 = vadd.f32 %v4879_v2, %v4878_v28  ;;  %v4914_v31 = vadd.f32 %v4913_v29, %v4912_v57  ;;  %v4881_v58 = vpop.f32.mrb[106].mxu1  ;;  %v4915_v18 = vpop.f32.mrb[106].mxu0 }
 0x628   : > { %v4882_v13 = vpop.f32.mrb[107].mxu1  ;;  %v4916_v20 = vpop.f32.mrb[107].mxu0 }
 0x629   : > { %v3884_v35 = vadd.f32 %v4880_v59, %v3827_v7  ;;  %v4883_v60 = vadd.f32 %v4882_v13, %v4881_v58  ;;  %v4917_v10 = vadd.f32 %v4916_v20, %v4915_v18 }
 0x62b   : > { %v3941_v32 = vadd.f32 %v4914_v31, %v3884_v35  ;;  %v3887_v34 = vadd.f32 %v4883_v60, %v3830_v30 }
 0x62d   : > { %v3944_v39 = vadd.f32 %v4917_v10, %v3887_v34 }
 0x635   : > { %v4934_v23 = vpop.f32.mrb[108].mxu1  ;;  %v4968_v61 = vpop.f32.mrb[108].mxu0 }
 0x636   : > { %v4935_v26 = vpop.f32.mrb[109].mxu1  ;;  %v4969_v21 = vpop.f32.mrb[109].mxu0 }
 0x637   : > { %v4936_v15 = vadd.f32 %v4935_v26, %v4934_v23  ;;  %v4970_v33 = vadd.f32 %v4969_v21, %v4968_v61  ;;  %v4937_v40 = vpop.f32.mrb[110].mxu1  ;;  %v4971_v46 = vpop.f32.mrb[110].mxu0 }
 0x638   : > { %v4938_v41 = vpop.f32.mrb[111].mxu1  ;;  %v4972_v55 = vpop.f32.mrb[111].mxu0 }
 0x639   : > { %v3982_v43 = vadd.f32 %v4936_v15, %v3925_v37  ;;  %v4939_v56 = vadd.f32 %v4938_v41, %v4937_v40  ;;  %v4973_v62 = vadd.f32 %v4972_v55, %v4971_v46 }
 0x63b   : > { %v4039_v36 = vadd.f32 %v4970_v33, %v3982_v43  ;;  %v3985_v7 = vadd.f32 %v4939_v56, %v3928_v38 }
 0x63d   : > { %v4042_v42 = vadd.f32 %v4973_v62, %v3985_v7  ;;  %v4940_v48 = vpop.f32.mrb[112].mxu1  ;;  %v4974_v25 = vpop.f32.mrb[112].mxu0 }
 0x63e   : > { %v4941_v30 = vpop.f32.mrb[113].mxu1  ;;  %v4975_v12 = vpop.f32.mrb[113].mxu0 }
 0x63f   : > { %v4942_v49 = vadd.f32 %v4941_v30, %v4940_v48  ;;  %v4976_v50 = vadd.f32 %v4975_v12, %v4974_v25  ;;  %v4943_v52 = vpop.f32.mrb[114].mxu1  ;;  %v4977_v53 = vpop.f32.mrb[114].mxu0 }
 0x640   : > { %v4944_v54 = vpop.f32.mrb[115].mxu1  ;;  %v4978_v5 = vpop.f32.mrb[115].mxu0 }
 0x641   : > { %v3990_v19 = vadd.f32 %v4942_v49, %v3933_v1  ;;  %v4945_v6 = vadd.f32 %v4944_v54, %v4943_v52  ;;  %v4979_v8 = vadd.f32 %v4978_v5, %v4977_v53 }
 0x643   : > { %v4047_v4 = vadd.f32 %v4976_v50, %v3990_v19  ;;  %v3993_v37 = vadd.f32 %v4945_v6, %v3936_v16 }
 0x645   : > { %v4050_v51 = vadd.f32 %v4979_v8, %v3993_v37  ;;  %v4946_v44 = vpop.f32.mrb[116].mxu1  ;;  %v4980_v63 = vpop.f32.mrb[116].mxu0 }
 0x646   : > { %v4947_v38 = vpop.f32.mrb[117].mxu1  ;;  %v4981_v14 = vpop.f32.mrb[117].mxu0 }
 0x647   : > { %v4948_v17 = vadd.f32 %v4947_v38, %v4946_v44  ;;  %v4982_v0 = vadd.f32 %v4981_v14, %v4980_v63  ;;  %v4949_v24 = vpop.f32.mrb[118].mxu1  ;;  %v4983_v11 = vpop.f32.mrb[118].mxu0 }
 0x648   : > { %v4950_v28 = vpop.f32.mrb[119].mxu1  ;;  %v4984_v57 = vpop.f32.mrb[119].mxu0 }
 0x649   : > { %v3998_v2 = vadd.f32 %v4948_v17, %v3941_v32  ;;  %v4951_v29 = vadd.f32 %v4950_v28, %v4949_v24  ;;  %v4985_v59 = vadd.f32 %v4984_v57, %v4983_v11 }
 0x64b   : > { %v4055_v31 = vadd.f32 %v4982_v0, %v3998_v2  ;;  %v4001_v1 = vadd.f32 %v4951_v29, %v3944_v39 }
 0x64d   : > { %v4058_v58 = vadd.f32 %v4985_v59, %v4001_v1 }
 0x656   : > { %v5002_v18 = vpop.f32.mrb[120].mxu1  ;;  %v5036_v13 = vpop.f32.mrb[120].mxu0 }
 0x657   : > { %v5003_v16 = vpop.f32.mrb[121].mxu1  ;;  %v5037_v20 = vpop.f32.mrb[121].mxu0 }
 0x658   : > { %v5004_v35 = vadd.f32 %v5003_v16, %v5002_v18  ;;  %v5038_v60 = vadd.f32 %v5037_v20, %v5036_v13  ;;  %v5005_v10 = vpop.f32.mrb[122].mxu1  ;;  %v5039_v34 = vpop.f32.mrb[122].mxu0 }
 0x659   : > { %v5006_v23 = vpop.f32.mrb[123].mxu1  ;;  %v5040_v61 = vpop.f32.mrb[123].mxu0 }
 0x65a   : > { %v4096_v26 = vadd.f32 %v5004_v35, %v4039_v36  ;;  %v5007_v21 = vadd.f32 %v5006_v23, %v5005_v10  ;;  %v5041_v15 = vadd.f32 %v5040_v61, %v5039_v34 }
 0x65c   : > { %v4153_v33 = vadd.f32 %v5038_v60, %v4096_v26  ;;  %v4099_v32 = vadd.f32 %v5007_v21, %v4042_v42 }
 0x65e   : > { %v4156_v40 = vadd.f32 %v5041_v15, %v4099_v32  ;;  %v5008_v46 = vpop.f32.mrb[124].mxu1  ;;  %v5042_v41 = vpop.f32.mrb[124].mxu0  ;;  %v4175_v39 = vadd.f32 %v4153_v33, %v5884_v3 }
 0x65f   : > { %v5009_v55 = vpop.f32.mrb[125].mxu1  ;;  %v5043_v43 = vpop.f32.mrb[125].mxu0 }
 0x660   : > { %v5010_v56 = vadd.f32 %v5009_v55, %v5008_v46  ;;  %v5044_v62 = vadd.f32 %v5043_v43, %v5042_v41  ;;  %v5011_v7 = vpop.f32.mrb[126].mxu1  ;;  %v5045_v48 = vpop.f32.mrb[126].mxu0  ;;  %v4183_v25 = vsel %vm854_vm2, %v4175_v39, 0.0  ;;  %v4176_v30 = vadd.f32 %v4156_v40, %v5887_v9 }
 0x661   : > { %v5012_v36 = vpop.f32.mrb[127].mxu1  ;;  %v5046_v12 = vpop.f32.mrb[127].mxu0  ;;  %4184 = vadd.xlane.f32.xlu0 %v4183_v25 }
 0x662   : > { %v4104_v49 = vadd.f32 %v5010_v56, %v4047_v4  ;;  %v5013_v42 = vadd.f32 %v5012_v36, %v5011_v7  ;;  %v5047_v50 = vadd.f32 %v5046_v12, %v5045_v48  ;;  %v4186_v52 = vsel %vm854_vm2, %v4176_v30, 0.0 }
 0x663   : > { %4187 = vadd.xlane.f32.xlu1 %v4186_v52 }
 0x664   : > { %v4161_v3 = vadd.f32 %v5044_v62, %v4104_v49  ;;  %v4107_v53 = vadd.f32 %v5013_v42, %v4050_v51 }
 0x666   : > { %v4164_v54 = vadd.f32 %v5047_v50, %v4107_v53  ;;  %v5014_v5 = vpop.f32.mrb[128].mxu1  ;;  %v5048_v19 = vpop.f32.mrb[128].mxu0  ;;  %v4177_v6 = vadd.f32 %v4161_v3, %v5923_v45 }
 0x667   : > { %v5015_v8 = vpop.f32.mrb[129].mxu1  ;;  %v5049_v37 = vpop.f32.mrb[129].mxu0 }
 0x668   : > { %v5016_v44 = vadd.f32 %v5015_v8, %v5014_v5  ;;  %v5050_v9 = vadd.f32 %v5049_v37, %v5048_v19  ;;  %v5017_v63 = vpop.f32.mrb[130].mxu1  ;;  %v5051_v38 = vpop.f32.mrb[130].mxu0  ;;  %v4189_v4 = vsel %vm854_vm2, %v4177_v6, 0.0  ;;  %v4178_v14 = vadd.f32 %v4164_v54, %v5926_v47  ;;  %v4723_v8 = vld [vmem:[%s800_s19] ss:$0 sm:$0xff] }
 0x669   : > { %v5018_v17 = vpop.f32.mrb[131].mxu1  ;;  %v5052_v0 = vpop.f32.mrb[131].mxu0  ;;  %4190 = vadd.xlane.f32.xlu0 %v4189_v4 }
 0x66a   : > { %v4112_v24 = vadd.f32 %v5016_v44, %v4055_v31  ;;  %v5019_v51 = vadd.f32 %v5018_v17, %v5017_v63  ;;  %v5053_v11 = vadd.f32 %v5052_v0, %v5051_v38  ;;  %v4192_v28 = vsel %vm854_vm2, %v4178_v14, 0.0  ;;  %v4724_v63 = vld [vmem:[%s803_s5] ss:$0 sm:$0xff] }
 0x66b   : > { %4193 = vadd.xlane.f32.xlu1 %v4192_v28 }
 0x66c   : > { %v4169_v45 = vadd.f32 %v5050_v9, %v4112_v24  ;;  %v4115_v57 = vadd.f32 %v5019_v51, %v4058_v58 }
 0x66e   : > { %v4172_v2 = vadd.f32 %v5053_v11, %v4115_v57  ;;  %v4179_v29 = vadd.f32 %v4169_v45, %v5946_v27 }
 0x670   : > { %v4195_v59 = vsel %vm854_vm2, %v4179_v29, 0.0  ;;  %v4180_v1 = vadd.f32 %v4172_v2, %v5943_v22 }
 0x671   : > { %4196 = vadd.xlane.f32.xlu0 %v4195_v59 }
 0x672   : > { %v4198_v47 = vsel %vm854_vm2, %v4180_v1, 0.0 }
 0x673   : > { %4199 = vadd.xlane.f32.xlu1 %v4198_v47 }
 0x6ee   : > { %v4185_v18 = vpop.xlane.xlu0 %4184 }
 0x6ef   : > { %v4201_v31 = vmul.f32 0.03125, %v4185_v18 }
 0x6f0   : > { %v4188_v13 = vpop.xlane.xlu1 %4187 }
 0x6f1   : > { %v4207_v16 = vsub.f32 %v4175_v39, %v4201_v31  ;;  %v4202_v20 = vmul.f32 0.03125, %v4188_v13 }
 0x6f3   : > { %v4208_v35 = vsub.f32 %v4176_v30, %v4202_v20  ;;  %v4213_v60 = vmul.f32 %v4207_v16, %v4207_v16 }
 0x6f5   : > { %v4219_v58 = vsel %vm854_vm2, %v4213_v60, 0.0  ;;  %v4214_v10 = vmul.f32 %v4208_v35, %v4208_v35 }
 0x6f6   : > { %4220 = vadd.xlane.f32.xlu0 %v4219_v58  ;;  %v4191_v27 = vpop.xlane.xlu0 %4190 }
 0x6f7   : > { %v4203_v34 = vmul.f32 0.03125, %v4191_v27  ;;  %v4222_v23 = vsel %vm854_vm2, %v4214_v10, 0.0 }
 0x6f8   : > { %4223 = vadd.xlane.f32.xlu1 %v4222_v23  ;;  %v4194_v22 = vpop.xlane.xlu1 %4193 }
 0x6f9   : > { %v4209_v61 = vsub.f32 %v4177_v6, %v4203_v34  ;;  %v4204_v26 = vmul.f32 0.03125, %v4194_v22 }
 0x6fb   : > { %v4210_v21 = vsub.f32 %v4178_v14, %v4204_v26  ;;  %v4215_v15 = vmul.f32 %v4209_v61, %v4209_v61 }
 0x6fd   : > { %v4225_v33 = vsel %vm854_vm2, %v4215_v15, 0.0  ;;  %v4216_v32 = vmul.f32 %v4210_v21, %v4210_v21 }
 0x6fe   : > { %4226 = vadd.xlane.f32.xlu0 %v4225_v33  ;;  %v4197_v40 = vpop.xlane.xlu0 %4196 }
 0x6ff   : > { %v4205_v46 = vmul.f32 0.03125, %v4197_v40  ;;  %v4228_v41 = vsel %vm854_vm2, %v4216_v32, 0.0 }
 0x700   : > { %4229 = vadd.xlane.f32.xlu1 %v4228_v41  ;;  %v4200_v39 = vpop.xlane.xlu1 %4199 }
 0x701   : > { %v4211_v55 = vsub.f32 %v4179_v29, %v4205_v46  ;;  %v4206_v43 = vmul.f32 0.03125, %v4200_v39 }
 0x703   : > { %v4212_v56 = vsub.f32 %v4180_v1, %v4206_v43  ;;  %v4217_v62 = vmul.f32 %v4211_v55, %v4211_v55 }
 0x705   : > { %v4231_v7 = vsel %vm854_vm2, %v4217_v62, 0.0  ;;  %v4218_v48 = vmul.f32 %v4212_v56, %v4212_v56 }
 0x706   : > { %4232 = vadd.xlane.f32.xlu0 %v4231_v7 }
 0x707   : > { %v4234_v25 = vsel %vm854_vm2, %v4218_v48, 0.0 }
 0x708   : > { %4235 = vadd.xlane.f32.xlu1 %v4234_v25 }
 0x783   : > { %v4221_v30 = vpop.xlane.xlu0 %4220 }
 0x784   : > { %v4237_v36 = vmul.f32 0.03125, %v4221_v30 }
 0x785   : > { %v4224_v12 = vpop.xlane.xlu1 %4223 }
 0x786   : > { %v4243_v49 = vadd.f32 1e-05, %v4237_v36  ;;  %v4238_v42 = vmul.f32 0.03125, %v4224_v12 }
 0x788   : > { %5406 = vrsqrt.f32 %v4243_v49  ;;  %v4244_v50 = vadd.f32 1e-05, %v4238_v42 }
 0x78a   : > { %5408 = vrsqrt.f32 %v4244_v50 }
 0x78b   : > { %v4227_v52 = vpop.xlane.xlu0 %4226 }
 0x78c   : > { %v4239_v3 = vmul.f32 0.03125, %v4227_v52 }
 0x78d   : > { %v4230_v53 = vpop.xlane.xlu1 %4229 }
 0x78e   : > { %v4245_v54 = vadd.f32 1e-05, %v4239_v3  ;;  %v4240_v5 = vmul.f32 0.03125, %v4230_v53 }
 0x790   : > { %5410 = vrsqrt.f32 %v4245_v54  ;;  %v4246_v19 = vadd.f32 1e-05, %v4240_v5 }
 0x792   : > { %v5407_v6 = vpop.eup %5406  ;;  %5412 = vrsqrt.f32 %v4246_v19 }
 0x793   : > { %v4255_v37 = vmul.f32 %v5407_v6, %v4207_v16  ;;  %v4233_v44 = vpop.xlane.xlu0 %4232 }
 0x794   : > { %v5409_v9 = vpop.eup %5408  ;;  %v4241_v38 = vmul.f32 0.03125, %v4233_v44 }
 0x795   : > { %v4267_v4 = vmul.f32 %v4723_v8, %v4255_v37  ;;  %v4256_v14 = vmul.f32 %v5409_v9, %v4208_v35  ;;  %v4236_v17 = vpop.xlane.xlu1 %4235 }
 0x796   : > { %v4247_v0 = vadd.f32 1e-05, %v4241_v38  ;;  %v4242_v24 = vmul.f32 0.03125, %v4236_v17 }
 0x797   : > { %v4279_v51 = vadd.f32 %v4724_v63, %v4267_v4  ;;  %v4268_v11 = vmul.f32 %v4723_v8, %v4256_v14 }
 0x798   : > { %5414 = vrsqrt.f32 %v4247_v0  ;;  %v4248_v28 = vadd.f32 1e-05, %v4242_v24 }
 0x799   : > { %4285 = vst.msk [vmem:[#allocation2] sm:$0xff] %vm854_vm2, %v4279_v51  ;;  %v4280_v45 = vadd.f32 %v4724_v63, %v4268_v11  ;;  %4295 = vst.msk [vmem:[%s6495_s1] sm:$0xff] (!%p4725_p5), %vm854_vm2, %v4279_v51 }
 0x79a   : > { %v5411_v57 = vpop.eup %5410  ;;  %5416 = vrsqrt.f32 %v4248_v28 }
 0x79b   : > { %4286 = vst.msk [vmem:[#allocation2 + $0x8] sm:$0xff] %vm854_vm2, %v4280_v45  ;;  %v4257_v2 = vmul.f32 %v5411_v57, %v4209_v61  ;;  %4296 = vst.msk [vmem:[%s6495_s1 + $0x8] sm:$0xff] (!%p4725_p5), %vm854_vm2, %v4280_v45 }
 0x79c   : > { %v5413_v29 = vpop.eup %5412 }
 0x79d   : > { %v4269_v59 = vmul.f32 %v4723_v8, %v4257_v2  ;;  %v4258_v1 = vmul.f32 %v5413_v29, %v4210_v21 }
 0x79f   : > { %v4281_v47 = vadd.f32 %v4724_v63, %v4269_v59  ;;  %v4270_v18 = vmul.f32 %v4723_v8, %v4258_v1 }
 0x7a1   : > { %4287 = vst.msk [vmem:[#allocation2 + $0x10] sm:$0xff] %vm854_vm2, %v4281_v47  ;;  %v4282_v31 = vadd.f32 %v4724_v63, %v4270_v18  ;;  %4297 = vst.msk [vmem:[%s6495_s1 + $0x10] sm:$0xff] (!%p4725_p5), %vm854_vm2, %v4281_v47 }
 0x7a2   : > { %v5415_v13 = vpop.eup %5414 }
 0x7a3   : > { %4288 = vst.msk [vmem:[#allocation2 + $0x18] sm:$0xff] %vm854_vm2, %v4282_v31  ;;  %v4259_v16 = vmul.f32 %v5415_v13, %v4211_v55  ;;  %4298 = vst.msk [vmem:[%s6495_s1 + $0x18] sm:$0xff] (!%p4725_p5), %vm854_vm2, %v4282_v31 }
 0x7a4   : > { %v5417_v20 = vpop.eup %5416 }
 0x7a5   : > { %v4271_v35 = vmul.f32 %v4723_v8, %v4259_v16  ;;  %v4260_v60 = vmul.f32 %v5417_v20, %v4212_v56  ;;  %4294 = sbr.rel (%p4725_p5) target bundleno = 1964 (0x7ac), region = 100 }
 0x7a7   : > { %v4283_v58 = vadd.f32 %v4724_v63, %v4271_v35  ;;  %v4272_v10 = vmul.f32 %v4723_v8, %v4260_v60 }
 0x7a9   : > { %4289 = vst.msk [vmem:[#allocation2 + $0x20] sm:$0xff] %vm854_vm2, %v4283_v58  ;;  %v4284_v27 = vadd.f32 %v4724_v63, %v4272_v10  ;;  %4299 = vst.msk [vmem:[%s6495_s1 + $0x20] sm:$0xff] (!%p4725_p5), %vm854_vm2, %v4283_v58 }
 0x7ab   : > { %4290 = vst.msk [vmem:[#allocation2 + $0x28] sm:$0xff] %vm854_vm2, %v4284_v27  ;;  %4300 = vst.msk [vmem:[%s6495_s1 + $0x28] sm:$0xff] (!%p4725_p5), %vm854_vm2, %v4284_v27 }
 0x7ac PF: > { %s6496_s21 = sld [smem:[#allocation4_spill]] }
 0x7b2   : > { %s28_s27 = sadd.s32 1, %s6496_s21  }
 0x7b3   : > { %p25_p6 = scmp.ge.s32.totalorder %s28_s27, 4  }
 0x7b5   :  { %27 = sbr.rel (!%p25_p6) target bundleno = 10 (0xa), region = 171 }

</bundles_post_ra>
